<compile_context>
chip_gen: v5e
topology: v5e:2x2
jax: 0.10.0
libtpu: 0.0.40
codegen_flags: <defaults>
</compile_context>

<pallas_src>
import functools

import jax
import jax.numpy as jnp
from jax.experimental import pallas as pl
from jax.experimental.pallas import tpu as pltpu


# ---------------------------------------------------------------------------
# Pallas kernels
# ---------------------------------------------------------------------------

def lstm_layer_kernel(x_ref, wih_ref, whh_ref, b_ref, hseq_ref, h_scr, c_scr,
                      *, hidden_pad, batch_pad, chunk):
    """One LSTM layer, one time-chunk per grid step (grid axis 0 = chunks, sequential).

    x_ref:    (Tc*Bp, Din)   chunk of inputs, time-major rows (t outer, batch inner)
    wih_ref:  (Din, 4*Hp)    input->gates weights (pre-transposed, gate-padded)
    whh_ref:  (Hp, 4*Hp)     hidden->gates weights (pre-transposed, gate-padded)
    b_ref:    (1, 4*Hp)      b_ih + b_hh (gate-padded)
    hseq_ref: (Tc*Bp, Hp)    hidden states of this chunk
    h_scr, c_scr: (Bp, Hp)   VMEM scratch carrying the recurrence across chunks
    """
    Hp, Bp, Tc = hidden_pad, batch_pad, chunk
    c_idx = pl.program_id(0)

    @pl.when(c_idx == 0)
    def _():
        h_scr[...] = jnp.zeros_like(h_scr)
        c_scr[...] = jnp.zeros_like(c_scr)

    # Hoisted input projection + bias for the whole chunk: one wide MXU matmul
    # with Tc*Bp rows instead of Tc tiny (Bp, Din) pushes.
    gin = (jnp.dot(x_ref[...], wih_ref[...],
                   preferred_element_type=jnp.float32)
           + b_ref[...])                              # (Tc*Bp, 4*Hp)

    whh = whh_ref[...]
    h = h_scr[...]
    c = c_scr[...]

    # Static (fully unrolled) recurrence over the chunk: only h @ W_hh per step.
    for t in range(Tc):
        gates = (gin[t * Bp:(t + 1) * Bp, :]
                 + jnp.dot(h, whh, preferred_element_type=jnp.float32))
        # PyTorch gate order: i, f, g, o — each gate occupies a 128-aligned block.
        i_g = jax.nn.sigmoid(gates[:, 0 * Hp:1 * Hp])
        f_g = jax.nn.sigmoid(gates[:, 1 * Hp:2 * Hp])
        g_g = jnp.tanh(gates[:, 2 * Hp:3 * Hp])
        o_g = jax.nn.sigmoid(gates[:, 3 * Hp:4 * Hp])
        c = f_g * c + i_g * g_g
        h = o_g * jnp.tanh(c)
        hseq_ref[t * Bp:(t + 1) * Bp, :] = h          # sublane-aligned, lane-dense

    h_scr[...] = h
    c_scr[...] = c


def fc_kernel(h_ref, w_ref, b_ref, o_ref):
    """Final Linear(H, 1), computed into a lane-padded (Bp, 128) slab."""
    o_ref[...] = (jnp.dot(h_ref[...], w_ref[...],
                          preferred_element_type=jnp.float32) + b_ref[...])


# ---------------------------------------------------------------------------
# Wrappers
# ---------------------------------------------------------------------------

def _round_up(x, m):
    return ((x + m - 1) // m) * m


def _pad_gate_cols(w, H, Hp):
    """w: (rows, 4H) with PyTorch gate order i,f,g,o along columns -> (rows, 4Hp)."""
    rows = w.shape[0]
    w4 = w.reshape(rows, 4, H)
    w4 = jnp.pad(w4, ((0, 0), (0, 0), (0, Hp - H)))
    return w4.reshape(rows, 4 * Hp)


def lstm_layer(x_tm, w_ih, w_hh, b_ih, b_hh, *, hidden_pad, chunk,
               last_chunk_only=False):
    """x_tm: (Tp, Bp, Din) time-major, padded. Returns (Tp, Bp, Hp) hidden sequence,
    or only the last time-chunk (Tc, Bp, Hp) if last_chunk_only."""
    Tp, Bp, Din = x_tm.shape
    Tc = chunk
    nchunks = Tp // Tc
    fourH, d_in = w_ih.shape
    H = fourH // 4
    Hp = hidden_pad

    # Pre-transpose + pad weights so each gate owns a 128-aligned column block.
    wih_t = _pad_gate_cols(jnp.transpose(w_ih).astype(jnp.float32), H, Hp)
    if Din > d_in:                                   # deeper layers see padded Hp inputs
        wih_t = jnp.pad(wih_t, ((0, Din - d_in), (0, 0)))
    whh_t = jnp.pad(
        _pad_gate_cols(jnp.transpose(w_hh).astype(jnp.float32), H, Hp),
        ((0, Hp - H), (0, 0)))
    bias = _pad_gate_cols((b_ih + b_hh).reshape(1, fourH).astype(jnp.float32), H, Hp)

    x2d = x_tm.astype(jnp.float32).reshape(Tp * Bp, Din)

    out_rows = (Tc if last_chunk_only else Tp) * Bp
    out_index_map = (lambda c: (0, 0)) if last_chunk_only else (lambda c: (c, 0))

    kernel = functools.partial(lstm_layer_kernel,
                               hidden_pad=Hp, batch_pad=Bp, chunk=Tc)

    h2d = pl.pallas_call(
        kernel,
        out_shape=jax.ShapeDtypeStruct((out_rows, Hp), jnp.float32),
        grid_spec=pltpu.PrefetchScalarGridSpec(
            num_scalar_prefetch=0,
            grid=(nchunks,),
            in_specs=[
                pl.BlockSpec((Tc * Bp, Din), lambda c: (c, 0)),
                pl.BlockSpec((Din, 4 * Hp), lambda c: (0, 0)),
                pl.BlockSpec((Hp, 4 * Hp), lambda c: (0, 0)),
                pl.BlockSpec((1, 4 * Hp), lambda c: (0, 0)),
            ],
            out_specs=pl.BlockSpec((Tc * Bp, Hp), out_index_map),
            scratch_shapes=[
                pltpu.VMEM((Bp, Hp), jnp.float32),   # h carry
                pltpu.VMEM((Bp, Hp), jnp.float32),   # c carry
            ],
        ),
        compiler_params=pltpu.CompilerParams(
            dimension_semantics=("arbitrary",)),     # time recurrence is sequential
    )(x2d, wih_t, whh_t, bias)

    return h2d.reshape(-1, Bp, Hp)


def fc(h_last, fc_w, fc_b, *, out_pad=128):
    """h_last: (Bp, Hp); fc_w: (1, H); fc_b: (1,).  Returns (Bp, out_pad)."""
    Bp, Hp = h_last.shape
    H = fc_w.shape[1]
    w = jnp.zeros((Hp, out_pad), jnp.float32).at[:H, 0].set(
        fc_w[0].astype(jnp.float32))
    b = jnp.zeros((1, out_pad), jnp.float32).at[0, 0].set(
        fc_b[0].astype(jnp.float32))
    return pl.pallas_call(
        fc_kernel,
        out_shape=jax.ShapeDtypeStruct((Bp, out_pad), jnp.float32),
    )(h_last.astype(jnp.float32), w, b)


def lstm_model(x, params, *, chunk=8):
    """x: (B, T, input_size), batch_first — same convention as the nn.Module."""
    B, T, Din = x.shape
    H = params["lstm"][0]["w_hh"].shape[1]
    Bp = _round_up(B, 8)        # sublane alignment (f32)
    Hp = _round_up(H, 128)      # lane alignment per gate block
    Tc = min(chunk, T)
    Tp = _round_up(T, Tc)

    # batch_first -> time-major, pad batch/time.  Padded hidden lanes stay exactly 0
    # through the recurrence (zero-padded weights/bias => c_pad=h_pad=0 forever).
    h = jnp.transpose(x, (1, 0, 2)).astype(jnp.float32)      # (T, B, Din)
    h = jnp.pad(h, ((0, Tp - T), (0, Bp - B), (0, 0)))       # (Tp, Bp, Din)

    n_layers = len(params["lstm"])
    for li, layer in enumerate(params["lstm"]):
        h = lstm_layer(h, layer["w_ih"], layer["w_hh"],
                       layer["b_ih"], layer["b_hh"],
                       hidden_pad=Hp, chunk=Tc,
                       last_chunk_only=(li == n_layers - 1))

    # Last layer returned only its final chunk; pick the row block for t = T-1.
    t_local = (T - 1) - (Tp - Tc)
    h_last = h[t_local]                                       # (Bp, Hp)
    out = fc(h_last, params["fc_w"], params["fc_b"])          # (Bp, 128)
    return out[:B, :1]


# ---------------------------------------------------------------------------
# Pure-JAX reference (correctness check only)
# ---------------------------------------------------------------------------

def lstm_model_ref(x, params):
    B, T, _ = x.shape
    seq = x
    for layer in params["lstm"]:
        H = layer["w_hh"].shape[1]
        h = jnp.zeros((B, H), jnp.float32)
        c = jnp.zeros((B, H), jnp.float32)
        outs = []
        for t in range(T):
            gates = (seq[:, t, :] @ layer["w_ih"].T + h @ layer["w_hh"].T
                     + layer["b_ih"] + layer["b_hh"])
            i_g = jax.nn.sigmoid(gates[:, 0 * H:1 * H])
            f_g = jax.nn.sigmoid(gates[:, 1 * H:2 * H])
            g_g = jnp.tanh(gates[:, 2 * H:3 * H])
            o_g = jax.nn.sigmoid(gates[:, 3 * H:4 * H])
            c = f_g * c + i_g * g_g
            h = o_g * jnp.tanh(c)
            outs.append(h)
        seq = jnp.stack(outs, axis=1)
    return seq[:, -1, :] @ params["fc_w"].T + params["fc_b"]


# ---------------------------------------------------------------------------
# Parameter init (PyTorch-style uniform(-1/sqrt(H), 1/sqrt(H)))
# ---------------------------------------------------------------------------

def init_params(key, input_size, hidden_size, num_layers):
    k = 1.0 / jnp.sqrt(jnp.float32(hidden_size))
    params = {"lstm": []}
    for layer in range(num_layers):
        d_in = input_size if layer == 0 else hidden_size
        key, k1, k2, k3, k4 = jax.random.split(key, 5)
        params["lstm"].append({
            "w_ih": jax.random.uniform(k1, (4 * hidden_size, d_in),
                                       jnp.float32, -k, k),
            "w_hh": jax.random.uniform(k2, (4 * hidden_size, hidden_size),
                                       jnp.float32, -k, k),
            "b_ih": jax.random.uniform(k3, (4 * hidden_size,),
                                       jnp.float32, -k, k),
            "b_hh": jax.random.uniform(k4, (4 * hidden_size,),
                                       jnp.float32, -k, k),
        })
    key, k5, k6 = jax.random.split(key, 3)
    params["fc_w"] = jax.random.uniform(k5, (1, hidden_size), jnp.float32, -k, k)
    params["fc_b"] = jax.random.uniform(k6, (1,), jnp.float32, -k, k)
    return params


# ---------------------------------------------------------------------------

if __name__ == "__main__":
    B, T, INPUT, HIDDEN, LAYERS = 2, 8, 4, 32, 2

    key = jax.random.PRNGKey(0)
    key, pkey, xkey = jax.random.split(key, 3)
    params = init_params(pkey, INPUT, HIDDEN, LAYERS)
    x = jax.random.normal(xkey, (B, T, INPUT), jnp.float32)

    out = jax.block_until_ready(lstm_model(x, params))        # (B, 1)
    ref = jax.block_until_ready(lstm_model_ref(x, params))    # (B, 1)

    assert out.shape == (B, 1), out.shape
    assert jnp.allclose(out, ref, atol=1e-4, rtol=1e-4), (out, ref)
    print("KERNEL_OK")
</pallas_src>

<mosaic_0001>
module attributes {stable_mosaic.version = 11 : i64} {
  func.func @lstm_layer_kernel(%arg0: i32, %arg1: memref<64x4xf32, #tpu.memory_space<vmem>>, %arg2: memref<4x512xf32, #tpu.memory_space<vmem>>, %arg3: memref<128x512xf32, #tpu.memory_space<vmem>>, %arg4: memref<1x512xf32, #tpu.memory_space<vmem>>, %arg5: memref<64x128xf32, #tpu.memory_space<vmem>>, %arg6: memref<8x128xf32, #tpu.memory_space<vmem>>, %arg7: memref<8x128xf32, #tpu.memory_space<vmem>>) attributes {dimension_semantics = [#tpu.dimension_semantics<arbitrary>], iteration_bounds = array<i64: 1>, scalar_prefetch = 0 : i64, scratch_operands = 2 : i64, tpu.core_type = #tpu.core_type<tc>, window_params = [{transform_indices = @transform_0, window_bounds = array<i64: 64, 4>}, {pipeline_mode = #tpu.pipeline_mode<synchronous>, transform_indices = @transform_1, window_bounds = array<i64: 4, 512>}, {pipeline_mode = #tpu.pipeline_mode<synchronous>, transform_indices = @transform_2, window_bounds = array<i64: 128, 512>}, {pipeline_mode = #tpu.pipeline_mode<synchronous>, transform_indices = @transform_3, window_bounds = array<i64: 1, 512>}, {transform_indices = @transform_4, window_bounds = array<i64: 64, 128>}]} {
    %c0_i32 = arith.constant 0 : i32
    %0 = arith.cmpi eq, %arg0, %c0_i32 : i32
    %1 = arith.extui %0 : i1 to i32
    %c0_i32_0 = arith.constant 0 : i32
    %2 = arith.cmpi ne, %1, %c0_i32_0 : i32
    scf.if %2 {
      %cst_57 = arith.constant 0.000000e+00 : f32
      %246 = vector.broadcast %cst_57 : f32 to vector<8x128xf32>
      %c0_58 = arith.constant 0 : index
      %c0_59 = arith.constant 0 : index
      %247 = vector.load %arg6[%c0_58, %c0_59] : memref<8x128xf32, #tpu.memory_space<vmem>>, vector<8x128xf32>
      tpu.vector_store %arg6[%c0_58, %c0_59], %246 {strides = array<i32>} : memref<8x128xf32, #tpu.memory_space<vmem>>, vector<8x128xf32>,
      %cst_60 = arith.constant 0.000000e+00 : f32
      %248 = vector.broadcast %cst_60 : f32 to vector<8x128xf32>
      %c0_61 = arith.constant 0 : index
      %c0_62 = arith.constant 0 : index
      %249 = vector.load %arg7[%c0_61, %c0_62] : memref<8x128xf32, #tpu.memory_space<vmem>>, vector<8x128xf32>
      tpu.vector_store %arg7[%c0_61, %c0_62], %248 {strides = array<i32>} : memref<8x128xf32, #tpu.memory_space<vmem>>, vector<8x128xf32>,
    } else {
    }
    %c0 = arith.constant 0 : index
    %c0_1 = arith.constant 0 : index
    %3 = vector.load %arg1[%c0, %c0_1] : memref<64x4xf32, #tpu.memory_space<vmem>>, vector<64x4xf32>
    %c0_2 = arith.constant 0 : index
    %c0_3 = arith.constant 0 : index
    %4 = vector.load %arg2[%c0_2, %c0_3] : memref<4x512xf32, #tpu.memory_space<vmem>>, vector<4x512xf32>
    %cst = arith.constant dense<0.000000e+00> : vector<64x512xf32>
    %5 = tpu.matmul %3, %4, %cst {dimension_numbers = #tpu.dot_dimension_numbers<[1], [0], [0], [1], [0, 0, 1, 1], [], []>} : vector<64x4xf32>, vector<4x512xf32>, vector<64x512xf32> -> vector<64x512xf32>
    %c0_4 = arith.constant 0 : index
    %c0_5 = arith.constant 0 : index
    %6 = vector.load %arg4[%c0_4, %c0_5] : memref<1x512xf32, #tpu.memory_space<vmem>>, vector<1x512xf32>
    %7 = vector.broadcast %6 : vector<1x512xf32> to vector<64x512xf32>
    %8 = arith.addf %5, %7 : vector<64x512xf32>
    %c0_6 = arith.constant 0 : index
    %c0_7 = arith.constant 0 : index
    %9 = vector.load %arg3[%c0_6, %c0_7] : memref<128x512xf32, #tpu.memory_space<vmem>>, vector<128x512xf32>
    %c0_8 = arith.constant 0 : index
    %c0_9 = arith.constant 0 : index
    %10 = vector.load %arg6[%c0_8, %c0_9] : memref<8x128xf32, #tpu.memory_space<vmem>>, vector<8x128xf32>
    %c0_10 = arith.constant 0 : index
    %c0_11 = arith.constant 0 : index
    %11 = vector.load %arg7[%c0_10, %c0_11] : memref<8x128xf32, #tpu.memory_space<vmem>>, vector<8x128xf32>
    %12 = vector.extract_strided_slice %8 {offsets = [0, 0], sizes = [8, 512], strides = [1, 1]} : vector<64x512xf32> to vector<8x512xf32>
    %cst_12 = arith.constant dense<0.000000e+00> : vector<8x512xf32>
    %13 = tpu.matmul %10, %9, %cst_12 {dimension_numbers = #tpu.dot_dimension_numbers<[1], [0], [0], [1], [0, 0, 1, 1], [], []>} : vector<8x128xf32>, vector<128x512xf32>, vector<8x512xf32> -> vector<8x512xf32>
    %14 = arith.addf %12, %13 : vector<8x512xf32>
    %15 = vector.extract_strided_slice %14 {offsets = [0, 0], sizes = [8, 128], strides = [1, 1]} : vector<8x512xf32> to vector<8x128xf32>
    %16 = arith.negf %15 : vector<8x128xf32>
    %17 = math.exp %16 : vector<8x128xf32>
    %cst_13 = arith.constant 1.000000e+00 : f32
    %18 = vector.broadcast %cst_13 : f32 to vector<8x128xf32>
    %19 = arith.addf %18, %17 : vector<8x128xf32>
    %20 = arith.divf %18, %19 : vector<8x128xf32>
    %21 = vector.extract_strided_slice %14 {offsets = [0, 128], sizes = [8, 128], strides = [1, 1]} : vector<8x512xf32> to vector<8x128xf32>
    %22 = arith.negf %21 : vector<8x128xf32>
    %23 = math.exp %22 : vector<8x128xf32>
    %cst_14 = arith.constant 1.000000e+00 : f32
    %24 = vector.broadcast %cst_14 : f32 to vector<8x128xf32>
    %25 = arith.addf %24, %23 : vector<8x128xf32>
    %26 = arith.divf %24, %25 : vector<8x128xf32>
    %27 = vector.extract_strided_slice %14 {offsets = [0, 256], sizes = [8, 128], strides = [1, 1]} : vector<8x512xf32> to vector<8x128xf32>
    %28 = math.tanh %27 : vector<8x128xf32>
    %29 = vector.extract_strided_slice %14 {offsets = [0, 384], sizes = [8, 128], strides = [1, 1]} : vector<8x512xf32> to vector<8x128xf32>
    %30 = arith.negf %29 : vector<8x128xf32>
    %31 = math.exp %30 : vector<8x128xf32>
    %cst_15 = arith.constant 1.000000e+00 : f32
    %32 = vector.broadcast %cst_15 : f32 to vector<8x128xf32>
    %33 = arith.addf %32, %31 : vector<8x128xf32>
    %34 = arith.divf %32, %33 : vector<8x128xf32>
    %35 = arith.mulf %26, %11 : vector<8x128xf32>
    %36 = arith.mulf %20, %28 : vector<8x128xf32>
    %37 = arith.addf %35, %36 : vector<8x128xf32>
    %38 = math.tanh %37 : vector<8x128xf32>
    %39 = arith.mulf %34, %38 : vector<8x128xf32>
    %c0_16 = arith.constant 0 : index
    %c0_17 = arith.constant 0 : index
    %40 = vector.load %arg5[%c0_16, %c0_17] : memref<64x128xf32, #tpu.memory_space<vmem>>, vector<8x128xf32>
    tpu.vector_store %arg5[%c0_16, %c0_17], %39 {strides = array<i32>} : memref<64x128xf32, #tpu.memory_space<vmem>>, vector<8x128xf32>,
    %41 = vector.extract_strided_slice %8 {offsets = [8, 0], sizes = [8, 512], strides = [1, 1]} : vector<64x512xf32> to vector<8x512xf32>
    %cst_18 = arith.constant dense<0.000000e+00> : vector<8x512xf32>
    %42 = tpu.matmul %39, %9, %cst_18 {dimension_numbers = #tpu.dot_dimension_numbers<[1], [0], [0], [1], [0, 0, 1, 1], [], []>} : vector<8x128xf32>, vector<128x512xf32>, vector<8x512xf32> -> vector<8x512xf32>
    %43 = arith.addf %41, %42 : vector<8x512xf32>
    %44 = vector.extract_strided_slice %43 {offsets = [0, 0], sizes = [8, 128], strides = [1, 1]} : vector<8x512xf32> to vector<8x128xf32>
    %45 = arith.negf %44 : vector<8x128xf32>
    %46 = math.exp %45 : vector<8x128xf32>
    %cst_19 = arith.constant 1.000000e+00 : f32
    %47 = vector.broadcast %cst_19 : f32 to vector<8x128xf32>
    %48 = arith.addf %47, %46 : vector<8x128xf32>
    %49 = arith.divf %47, %48 : vector<8x128xf32>
    %50 = vector.extract_strided_slice %43 {offsets = [0, 128], sizes = [8, 128], strides = [1, 1]} : vector<8x512xf32> to vector<8x128xf32>
    %51 = arith.negf %50 : vector<8x128xf32>
    %52 = math.exp %51 : vector<8x128xf32>
    %cst_20 = arith.constant 1.000000e+00 : f32
    %53 = vector.broadcast %cst_20 : f32 to vector<8x128xf32>
    %54 = arith.addf %53, %52 : vector<8x128xf32>
    %55 = arith.divf %53, %54 : vector<8x128xf32>
    %56 = vector.extract_strided_slice %43 {offsets = [0, 256], sizes = [8, 128], strides = [1, 1]} : vector<8x512xf32> to vector<8x128xf32>
    %57 = math.tanh %56 : vector<8x128xf32>
    %58 = vector.extract_strided_slice %43 {offsets = [0, 384], sizes = [8, 128], strides = [1, 1]} : vector<8x512xf32> to vector<8x128xf32>
    %59 = arith.negf %58 : vector<8x128xf32>
    %60 = math.exp %59 : vector<8x128xf32>
    %cst_21 = arith.constant 1.000000e+00 : f32
    %61 = vector.broadcast %cst_21 : f32 to vector<8x128xf32>
    %62 = arith.addf %61, %60 : vector<8x128xf32>
    %63 = arith.divf %61, %62 : vector<8x128xf32>
    %64 = arith.mulf %55, %37 : vector<8x128xf32>
    %65 = arith.mulf %49, %57 : vector<8x128xf32>
    %66 = arith.addf %64, %65 : vector<8x128xf32>
    %67 = math.tanh %66 : vector<8x128xf32>
    %68 = arith.mulf %63, %67 : vector<8x128xf32>
    %c8 = arith.constant 8 : index
    %c0_22 = arith.constant 0 : index
    %69 = vector.load %arg5[%c8, %c0_22] : memref<64x128xf32, #tpu.memory_space<vmem>>, vector<8x128xf32>
    tpu.vector_store %arg5[%c8, %c0_22], %68 {strides = array<i32>} : memref<64x128xf32, #tpu.memory_space<vmem>>, vector<8x128xf32>,
    %70 = vector.extract_strided_slice %8 {offsets = [16, 0], sizes = [8, 512], strides = [1, 1]} : vector<64x512xf32> to vector<8x512xf32>
    %cst_23 = arith.constant dense<0.000000e+00> : vector<8x512xf32>
    %71 = tpu.matmul %68, %9, %cst_23 {dimension_numbers = #tpu.dot_dimension_numbers<[1], [0], [0], [1], [0, 0, 1, 1], [], []>} : vector<8x128xf32>, vector<128x512xf32>, vector<8x512xf32> -> vector<8x512xf32>
    %72 = arith.addf %70, %71 : vector<8x512xf32>
    %73 = vector.extract_strided_slice %72 {offsets = [0, 0], sizes = [8, 128], strides = [1, 1]} : vector<8x512xf32> to vector<8x128xf32>
    %74 = arith.negf %73 : vector<8x128xf32>
    %75 = math.exp %74 : vector<8x128xf32>
    %cst_24 = arith.constant 1.000000e+00 : f32
    %76 = vector.broadcast %cst_24 : f32 to vector<8x128xf32>
    %77 = arith.addf %76, %75 : vector<8x128xf32>
    %78 = arith.divf %76, %77 : vector<8x128xf32>
    %79 = vector.extract_strided_slice %72 {offsets = [0, 128], sizes = [8, 128], strides = [1, 1]} : vector<8x512xf32> to vector<8x128xf32>
    %80 = arith.negf %79 : vector<8x128xf32>
    %81 = math.exp %80 : vector<8x128xf32>
    %cst_25 = arith.constant 1.000000e+00 : f32
    %82 = vector.broadcast %cst_25 : f32 to vector<8x128xf32>
    %83 = arith.addf %82, %81 : vector<8x128xf32>
    %84 = arith.divf %82, %83 : vector<8x128xf32>
    %85 = vector.extract_strided_slice %72 {offsets = [0, 256], sizes = [8, 128], strides = [1, 1]} : vector<8x512xf32> to vector<8x128xf32>
    %86 = math.tanh %85 : vector<8x128xf32>
    %87 = vector.extract_strided_slice %72 {offsets = [0, 384], sizes = [8, 128], strides = [1, 1]} : vector<8x512xf32> to vector<8x128xf32>
    %88 = arith.negf %87 : vector<8x128xf32>
    %89 = math.exp %88 : vector<8x128xf32>
    %cst_26 = arith.constant 1.000000e+00 : f32
    %90 = vector.broadcast %cst_26 : f32 to vector<8x128xf32>
    %91 = arith.addf %90, %89 : vector<8x128xf32>
    %92 = arith.divf %90, %91 : vector<8x128xf32>
    %93 = arith.mulf %84, %66 : vector<8x128xf32>
    %94 = arith.mulf %78, %86 : vector<8x128xf32>
    %95 = arith.addf %93, %94 : vector<8x128xf32>
    %96 = math.tanh %95 : vector<8x128xf32>
    %97 = arith.mulf %92, %96 : vector<8x128xf32>
    %c16 = arith.constant 16 : index
    %c0_27 = arith.constant 0 : index
    %98 = vector.load %arg5[%c16, %c0_27] : memref<64x128xf32, #tpu.memory_space<vmem>>, vector<8x128xf32>
    tpu.vector_store %arg5[%c16, %c0_27], %97 {strides = array<i32>} : memref<64x128xf32, #tpu.memory_space<vmem>>, vector<8x128xf32>,
    %99 = vector.extract_strided_slice %8 {offsets = [24, 0], sizes = [8, 512], strides = [1, 1]} : vector<64x512xf32> to vector<8x512xf32>
    %cst_28 = arith.constant dense<0.000000e+00> : vector<8x512xf32>
    %100 = tpu.matmul %97, %9, %cst_28 {dimension_numbers = #tpu.dot_dimension_numbers<[1], [0], [0], [1], [0, 0, 1, 1], [], []>} : vector<8x128xf32>, vector<128x512xf32>, vector<8x512xf32> -> vector<8x512xf32>
    %101 = arith.addf %99, %100 : vector<8x512xf32>
    %102 = vector.extract_strided_slice %101 {offsets = [0, 0], sizes = [8, 128], strides = [1, 1]} : vector<8x512xf32> to vector<8x128xf32>
    %103 = arith.negf %102 : vector<8x128xf32>
    %104 = math.exp %103 : vector<8x128xf32>
    %cst_29 = arith.constant 1.000000e+00 : f32
    %105 = vector.broadcast %cst_29 : f32 to vector<8x128xf32>
    %106 = arith.addf %105, %104 : vector<8x128xf32>
    %107 = arith.divf %105, %106 : vector<8x128xf32>
    %108 = vector.extract_strided_slice %101 {offsets = [0, 128], sizes = [8, 128], strides = [1, 1]} : vector<8x512xf32> to vector<8x128xf32>
    %109 = arith.negf %108 : vector<8x128xf32>
    %110 = math.exp %109 : vector<8x128xf32>
    %cst_30 = arith.constant 1.000000e+00 : f32
    %111 = vector.broadcast %cst_30 : f32 to vector<8x128xf32>
    %112 = arith.addf %111, %110 : vector<8x128xf32>
    %113 = arith.divf %111, %112 : vector<8x128xf32>
    %114 = vector.extract_strided_slice %101 {offsets = [0, 256], sizes = [8, 128], strides = [1, 1]} : vector<8x512xf32> to vector<8x128xf32>
    %115 = math.tanh %114 : vector<8x128xf32>
    %116 = vector.extract_strided_slice %101 {offsets = [0, 384], sizes = [8, 128], strides = [1, 1]} : vector<8x512xf32> to vector<8x128xf32>
    %117 = arith.negf %116 : vector<8x128xf32>
    %118 = math.exp %117 : vector<8x128xf32>
    %cst_31 = arith.constant 1.000000e+00 : f32
    %119 = vector.broadcast %cst_31 : f32 to vector<8x128xf32>
    %120 = arith.addf %119, %118 : vector<8x128xf32>
    %121 = arith.divf %119, %120 : vector<8x128xf32>
    %122 = arith.mulf %113, %95 : vector<8x128xf32>
    %123 = arith.mulf %107, %115 : vector<8x128xf32>
    %124 = arith.addf %122, %123 : vector<8x128xf32>
    %125 = math.tanh %124 : vector<8x128xf32>
    %126 = arith.mulf %121, %125 : vector<8x128xf32>
    %c24 = arith.constant 24 : index
    %c0_32 = arith.constant 0 : index
    %127 = vector.load %arg5[%c24, %c0_32] : memref<64x128xf32, #tpu.memory_space<vmem>>, vector<8x128xf32>
    tpu.vector_store %arg5[%c24, %c0_32], %126 {strides = array<i32>} : memref<64x128xf32, #tpu.memory_space<vmem>>, vector<8x128xf32>,
    %128 = vector.extract_strided_slice %8 {offsets = [32, 0], sizes = [8, 512], strides = [1, 1]} : vector<64x512xf32> to vector<8x512xf32>
    %cst_33 = arith.constant dense<0.000000e+00> : vector<8x512xf32>
    %129 = tpu.matmul %126, %9, %cst_33 {dimension_numbers = #tpu.dot_dimension_numbers<[1], [0], [0], [1], [0, 0, 1, 1], [], []>} : vector<8x128xf32>, vector<128x512xf32>, vector<8x512xf32> -> vector<8x512xf32>
    %130 = arith.addf %128, %129 : vector<8x512xf32>
    %131 = vector.extract_strided_slice %130 {offsets = [0, 0], sizes = [8, 128], strides = [1, 1]} : vector<8x512xf32> to vector<8x128xf32>
    %132 = arith.negf %131 : vector<8x128xf32>
    %133 = math.exp %132 : vector<8x128xf32>
    %cst_34 = arith.constant 1.000000e+00 : f32
    %134 = vector.broadcast %cst_34 : f32 to vector<8x128xf32>
    %135 = arith.addf %134, %133 : vector<8x128xf32>
    %136 = arith.divf %134, %135 : vector<8x128xf32>
    %137 = vector.extract_strided_slice %130 {offsets = [0, 128], sizes = [8, 128], strides = [1, 1]} : vector<8x512xf32> to vector<8x128xf32>
    %138 = arith.negf %137 : vector<8x128xf32>
    %139 = math.exp %138 : vector<8x128xf32>
    %cst_35 = arith.constant 1.000000e+00 : f32
    %140 = vector.broadcast %cst_35 : f32 to vector<8x128xf32>
    %141 = arith.addf %140, %139 : vector<8x128xf32>
    %142 = arith.divf %140, %141 : vector<8x128xf32>
    %143 = vector.extract_strided_slice %130 {offsets = [0, 256], sizes = [8, 128], strides = [1, 1]} : vector<8x512xf32> to vector<8x128xf32>
    %144 = math.tanh %143 : vector<8x128xf32>
    %145 = vector.extract_strided_slice %130 {offsets = [0, 384], sizes = [8, 128], strides = [1, 1]} : vector<8x512xf32> to vector<8x128xf32>
    %146 = arith.negf %145 : vector<8x128xf32>
    %147 = math.exp %146 : vector<8x128xf32>
    %cst_36 = arith.constant 1.000000e+00 : f32
    %148 = vector.broadcast %cst_36 : f32 to vector<8x128xf32>
    %149 = arith.addf %148, %147 : vector<8x128xf32>
    %150 = arith.divf %148, %149 : vector<8x128xf32>
    %151 = arith.mulf %142, %124 : vector<8x128xf32>
    %152 = arith.mulf %136, %144 : vector<8x128xf32>
    %153 = arith.addf %151, %152 : vector<8x128xf32>
    %154 = math.tanh %153 : vector<8x128xf32>
    %155 = arith.mulf %150, %154 : vector<8x128xf32>
    %c32 = arith.constant 32 : index
    %c0_37 = arith.constant 0 : index
    %156 = vector.load %arg5[%c32, %c0_37] : memref<64x128xf32, #tpu.memory_space<vmem>>, vector<8x128xf32>
    tpu.vector_store %arg5[%c32, %c0_37], %155 {strides = array<i32>} : memref<64x128xf32, #tpu.memory_space<vmem>>, vector<8x128xf32>,
    %157 = vector.extract_strided_slice %8 {offsets = [40, 0], sizes = [8, 512], strides = [1, 1]} : vector<64x512xf32> to vector<8x512xf32>
    %cst_38 = arith.constant dense<0.000000e+00> : vector<8x512xf32>
    %158 = tpu.matmul %155, %9, %cst_38 {dimension_numbers = #tpu.dot_dimension_numbers<[1], [0], [0], [1], [0, 0, 1, 1], [], []>} : vector<8x128xf32>, vector<128x512xf32>, vector<8x512xf32> -> vector<8x512xf32>
    %159 = arith.addf %157, %158 : vector<8x512xf32>
    %160 = vector.extract_strided_slice %159 {offsets = [0, 0], sizes = [8, 128], strides = [1, 1]} : vector<8x512xf32> to vector<8x128xf32>
    %161 = arith.negf %160 : vector<8x128xf32>
    %162 = math.exp %161 : vector<8x128xf32>
    %cst_39 = arith.constant 1.000000e+00 : f32
    %163 = vector.broadcast %cst_39 : f32 to vector<8x128xf32>
    %164 = arith.addf %163, %162 : vector<8x128xf32>
    %165 = arith.divf %163, %164 : vector<8x128xf32>
    %166 = vector.extract_strided_slice %159 {offsets = [0, 128], sizes = [8, 128], strides = [1, 1]} : vector<8x512xf32> to vector<8x128xf32>
    %167 = arith.negf %166 : vector<8x128xf32>
    %168 = math.exp %167 : vector<8x128xf32>
    %cst_40 = arith.constant 1.000000e+00 : f32
    %169 = vector.broadcast %cst_40 : f32 to vector<8x128xf32>
    %170 = arith.addf %169, %168 : vector<8x128xf32>
    %171 = arith.divf %169, %170 : vector<8x128xf32>
    %172 = vector.extract_strided_slice %159 {offsets = [0, 256], sizes = [8, 128], strides = [1, 1]} : vector<8x512xf32> to vector<8x128xf32>
    %173 = math.tanh %172 : vector<8x128xf32>
    %174 = vector.extract_strided_slice %159 {offsets = [0, 384], sizes = [8, 128], strides = [1, 1]} : vector<8x512xf32> to vector<8x128xf32>
    %175 = arith.negf %174 : vector<8x128xf32>
    %176 = math.exp %175 : vector<8x128xf32>
    %cst_41 = arith.constant 1.000000e+00 : f32
    %177 = vector.broadcast %cst_41 : f32 to vector<8x128xf32>
    %178 = arith.addf %177, %176 : vector<8x128xf32>
    %179 = arith.divf %177, %178 : vector<8x128xf32>
    %180 = arith.mulf %171, %153 : vector<8x128xf32>
    %181 = arith.mulf %165, %173 : vector<8x128xf32>
    %182 = arith.addf %180, %181 : vector<8x128xf32>
    %183 = math.tanh %182 : vector<8x128xf32>
    %184 = arith.mulf %179, %183 : vector<8x128xf32>
    %c40 = arith.constant 40 : index
    %c0_42 = arith.constant 0 : index
    %185 = vector.load %arg5[%c40, %c0_42] : memref<64x128xf32, #tpu.memory_space<vmem>>, vector<8x128xf32>
    tpu.vector_store %arg5[%c40, %c0_42], %184 {strides = array<i32>} : memref<64x128xf32, #tpu.memory_space<vmem>>, vector<8x128xf32>,
    %186 = vector.extract_strided_slice %8 {offsets = [48, 0], sizes = [8, 512], strides = [1, 1]} : vector<64x512xf32> to vector<8x512xf32>
    %cst_43 = arith.constant dense<0.000000e+00> : vector<8x512xf32>
    %187 = tpu.matmul %184, %9, %cst_43 {dimension_numbers = #tpu.dot_dimension_numbers<[1], [0], [0], [1], [0, 0, 1, 1], [], []>} : vector<8x128xf32>, vector<128x512xf32>, vector<8x512xf32> -> vector<8x512xf32>
    %188 = arith.addf %186, %187 : vector<8x512xf32>
    %189 = vector.extract_strided_slice %188 {offsets = [0, 0], sizes = [8, 128], strides = [1, 1]} : vector<8x512xf32> to vector<8x128xf32>
    %190 = arith.negf %189 : vector<8x128xf32>
    %191 = math.exp %190 : vector<8x128xf32>
    %cst_44 = arith.constant 1.000000e+00 : f32
    %192 = vector.broadcast %cst_44 : f32 to vector<8x128xf32>
    %193 = arith.addf %192, %191 : vector<8x128xf32>
    %194 = arith.divf %192, %193 : vector<8x128xf32>
    %195 = vector.extract_strided_slice %188 {offsets = [0, 128], sizes = [8, 128], strides = [1, 1]} : vector<8x512xf32> to vector<8x128xf32>
    %196 = arith.negf %195 : vector<8x128xf32>
    %197 = math.exp %196 : vector<8x128xf32>
    %cst_45 = arith.constant 1.000000e+00 : f32
    %198 = vector.broadcast %cst_45 : f32 to vector<8x128xf32>
    %199 = arith.addf %198, %197 : vector<8x128xf32>
    %200 = arith.divf %198, %199 : vector<8x128xf32>
    %201 = vector.extract_strided_slice %188 {offsets = [0, 256], sizes = [8, 128], strides = [1, 1]} : vector<8x512xf32> to vector<8x128xf32>
    %202 = math.tanh %201 : vector<8x128xf32>
    %203 = vector.extract_strided_slice %188 {offsets = [0, 384], sizes = [8, 128], strides = [1, 1]} : vector<8x512xf32> to vector<8x128xf32>
    %204 = arith.negf %203 : vector<8x128xf32>
    %205 = math.exp %204 : vector<8x128xf32>
    %cst_46 = arith.constant 1.000000e+00 : f32
    %206 = vector.broadcast %cst_46 : f32 to vector<8x128xf32>
    %207 = arith.addf %206, %205 : vector<8x128xf32>
    %208 = arith.divf %206, %207 : vector<8x128xf32>
    %209 = arith.mulf %200, %182 : vector<8x128xf32>
    %210 = arith.mulf %194, %202 : vector<8x128xf32>
    %211 = arith.addf %209, %210 : vector<8x128xf32>
    %212 = math.tanh %211 : vector<8x128xf32>
    %213 = arith.mulf %208, %212 : vector<8x128xf32>
    %c48 = arith.constant 48 : index
    %c0_47 = arith.constant 0 : index
    %214 = vector.load %arg5[%c48, %c0_47] : memref<64x128xf32, #tpu.memory_space<vmem>>, vector<8x128xf32>
    tpu.vector_store %arg5[%c48, %c0_47], %213 {strides = array<i32>} : memref<64x128xf32, #tpu.memory_space<vmem>>, vector<8x128xf32>,
    %215 = vector.extract_strided_slice %8 {offsets = [56, 0], sizes = [8, 512], strides = [1, 1]} : vector<64x512xf32> to vector<8x512xf32>
    %cst_48 = arith.constant dense<0.000000e+00> : vector<8x512xf32>
    %216 = tpu.matmul %213, %9, %cst_48 {dimension_numbers = #tpu.dot_dimension_numbers<[1], [0], [0], [1], [0, 0, 1, 1], [], []>} : vector<8x128xf32>, vector<128x512xf32>, vector<8x512xf32> -> vector<8x512xf32>
    %217 = arith.addf %215, %216 : vector<8x512xf32>
    %218 = vector.extract_strided_slice %217 {offsets = [0, 0], sizes = [8, 128], strides = [1, 1]} : vector<8x512xf32> to vector<8x128xf32>
    %219 = arith.negf %218 : vector<8x128xf32>
    %220 = math.exp %219 : vector<8x128xf32>
    %cst_49 = arith.constant 1.000000e+00 : f32
    %221 = vector.broadcast %cst_49 : f32 to vector<8x128xf32>
    %222 = arith.addf %221, %220 : vector<8x128xf32>
    %223 = arith.divf %221, %222 : vector<8x128xf32>
    %224 = vector.extract_strided_slice %217 {offsets = [0, 128], sizes = [8, 128], strides = [1, 1]} : vector<8x512xf32> to vector<8x128xf32>
    %225 = arith.negf %224 : vector<8x128xf32>
    %226 = math.exp %225 : vector<8x128xf32>
    %cst_50 = arith.constant 1.000000e+00 : f32
    %227 = vector.broadcast %cst_50 : f32 to vector<8x128xf32>
    %228 = arith.addf %227, %226 : vector<8x128xf32>
    %229 = arith.divf %227, %228 : vector<8x128xf32>
    %230 = vector.extract_strided_slice %217 {offsets = [0, 256], sizes = [8, 128], strides = [1, 1]} : vector<8x512xf32> to vector<8x128xf32>
    %231 = math.tanh %230 : vector<8x128xf32>
    %232 = vector.extract_strided_slice %217 {offsets = [0, 384], sizes = [8, 128], strides = [1, 1]} : vector<8x512xf32> to vector<8x128xf32>
    %233 = arith.negf %232 : vector<8x128xf32>
    %234 = math.exp %233 : vector<8x128xf32>
    %cst_51 = arith.constant 1.000000e+00 : f32
    %235 = vector.broadcast %cst_51 : f32 to vector<8x128xf32>
    %236 = arith.addf %235, %234 : vector<8x128xf32>
    %237 = arith.divf %235, %236 : vector<8x128xf32>
    %238 = arith.mulf %229, %211 : vector<8x128xf32>
    %239 = arith.mulf %223, %231 : vector<8x128xf32>
    %240 = arith.addf %238, %239 : vector<8x128xf32>
    %241 = math.tanh %240 : vector<8x128xf32>
    %242 = arith.mulf %237, %241 : vector<8x128xf32>
    %c56 = arith.constant 56 : index
    %c0_52 = arith.constant 0 : index
    %243 = vector.load %arg5[%c56, %c0_52] : memref<64x128xf32, #tpu.memory_space<vmem>>, vector<8x128xf32>
    tpu.vector_store %arg5[%c56, %c0_52], %242 {strides = array<i32>} : memref<64x128xf32, #tpu.memory_space<vmem>>, vector<8x128xf32>,
    %c0_53 = arith.constant 0 : index
    %c0_54 = arith.constant 0 : index
    %244 = vector.load %arg6[%c0_53, %c0_54] : memref<8x128xf32, #tpu.memory_space<vmem>>, vector<8x128xf32>
    tpu.vector_store %arg6[%c0_53, %c0_54], %242 {strides = array<i32>} : memref<8x128xf32, #tpu.memory_space<vmem>>, vector<8x128xf32>,
    %c0_55 = arith.constant 0 : index
    %c0_56 = arith.constant 0 : index
    %245 = vector.load %arg7[%c0_55, %c0_56] : memref<8x128xf32, #tpu.memory_space<vmem>>, vector<8x128xf32>
    tpu.vector_store %arg7[%c0_55, %c0_56], %240 {strides = array<i32>} : memref<8x128xf32, #tpu.memory_space<vmem>>, vector<8x128xf32>,
    return
  }
  func.func @transform_0(%arg0: i32) -> (i32, i32) {
    %c0_i32 = arith.constant 0 : i32
    %c0_i32_0 = arith.constant 0 : i32
    return %arg0, %c0_i32 : i32, i32
  }
  func.func @transform_1(%arg0: i32) -> (i32, i32) {
    %c0_i32 = arith.constant 0 : i32
    %c0_i32_0 = arith.constant 0 : i32
    %c0_i32_1 = arith.constant 0 : i32
    return %c0_i32, %c0_i32_0 : i32, i32
  }
  func.func @transform_2(%arg0: i32) -> (i32, i32) {
    %c0_i32 = arith.constant 0 : i32
    %c0_i32_0 = arith.constant 0 : i32
    %c0_i32_1 = arith.constant 0 : i32
    return %c0_i32, %c0_i32_0 : i32, i32
  }
  func.func @transform_3(%arg0: i32) -> (i32, i32) {
    %c0_i32 = arith.constant 0 : i32
    %c0_i32_0 = arith.constant 0 : i32
    %c0_i32_1 = arith.constant 0 : i32
    return %c0_i32, %c0_i32_0 : i32, i32
  }
  func.func @transform_4(%arg0: i32) -> (i32, i32) {
    %c0_i32 = arith.constant 0 : i32
    %c0_i32_0 = arith.constant 0 : i32
    return %arg0, %c0_i32 : i32, i32
  }
}

</mosaic_0001>

<bundles_post_ra>
// kernel: tpu_custom_call.1
= control target key start
LH: loop header
LB: loop body
LE: loop exit
PB: predicated region body
PF: predicated region fallthrough
CT: control target
= control target key end

     0   :  { %9 = vsyncpa [#allocation5], 0  ;;  %s2848_s0 = inlined_call_operand.vmem [shape: f32[64,4], index: 0, kind: input, shape index: {}]   ;;  %s2849_s1 = inlined_call_operand.vmem [shape: f32[4,512], index: 1, kind: input, shape index: {}]   ;;  %s2850_s2 = inlined_call_operand.hbm [shape: f32[128,512], index: 2, kind: input, shape index: {}]   ;;  %s2851_s3 = inlined_call_operand.vmem [shape: f32[1,512], index: 3, kind: input, shape index: {}]   ;;  %s2852_s4 = inlined_call_operand.hbm [shape: f32[64,128], index: 4, kind: output, shape index: {}]  }
   0x1   :  { %10 = vsyncpa [#allocation6], 0  ;;  %s19_s17 = sshll.u32 %s2850_s2, 4  ;;  %s1849_s18 = smov [#allocation4]   ;;  %s20_s17 = int_to_ptr.hbm [resolvable:$true] %s19_s17 }
   0x2   :  { %s21_s19 = sshll.u32 %s1849_s18, 4  ;;  %s1850_s20 = smov 512   ;;  %s22_s19 = int_to_ptr.vmem [resolvable:$true] %s21_s19 }
   0x3   :  { %s1851_s21 = smov 32  }
   0x4   :  { %27 = dma.hbm_to_vmem [thread:$0]  %s20_s17, 8192, %s22_s19, [#allocation5], %s1850_s20, %s1850_s20, %s1851_s21  }
   0x5   :  { %1845 = dma.done.wait [#allocation5], 8192  }
   0x6   :  { %1846 = vsyncadd [#allocation5], 4294959104  ;;  %v48_v0 = vld [vmem:[%s2849_s1] sm:$0xff]  ;;  %v49_v1 = vld [vmem:[%s2849_s1 + $0x8] sm:$0xff]  ;;  %vm94_vm0 = vcmask 1043456   ;;  %vm69_vm1 = vcmask 31744  }
   0x7   :  { %62 = vst [vmem:[#allocation1] ss:$2 sm:$0xff] %v48_v0  ;;  %v40_v2 = vld [vmem:[%s2848_s0] sm:$0xff]  ;;  %v1893_v7 = vld [vmem:[#allocation4 + $0x1e0] sm:$0xff]  ;;  %v1895_v8 = vld [vmem:[#allocation4 + $0x1e8] sm:$0xff]  ;;  %s1525_s18 = sshll.u32 %s2852_s4, 4  ;;  %s1526_s18 = int_to_ptr.hbm [resolvable:$true] %s1525_s18 }
   0x8   :  { %64 = vst [vmem:[#allocation1 + $0x10] ss:$2 sm:$0xff] %v49_v1  ;;  %v1899_v9 = vld [vmem:[#allocation4 + $0x1f8] sm:$0xff]  ;;  %v1901_v10 = vld [vmem:[#allocation4 + $0x1f0] sm:$0xff]  ;;  %v1905_v11 = vld [vmem:[#allocation4 + $0x1c0] sm:$0xff]  ;;  %s1854_s19 = smov 128  }
   0x9   :  { %v1907_v12 = vld [vmem:[#allocation4 + $0x1c8] sm:$0xff]  ;;  %v1911_v13 = vld [vmem:[#allocation4 + $0x1d8] sm:$0xff]  ;;  %v1913_v14 = vld [vmem:[#allocation4 + $0x1d0] sm:$0xff]  ;;  %s1855_s20 = smov 8  }
   0xa   :  { %v1916_v15 = vld [vmem:[#allocation4 + $0x1a0] sm:$0xff]  ;;  %v1918_v16 = vld [vmem:[#allocation4 + $0x1a8] sm:$0xff]  ;;  %v1923_v17 = vld [vmem:[#allocation4 + $0x1b8] sm:$0xff] }
   0xb   :  { %v1925_v18 = vld [vmem:[#allocation4 + $0x1b0] sm:$0xff]  ;;  %v41_v19 = vld [vmem:[%s2848_s0 + $0x8] sm:$0xff]  ;;  %v1936_v21 = vld [vmem:[#allocation4 + $0x188] sm:$0xff] }
   0xc   :  { %v1934_v20 = vld [vmem:[#allocation4 + $0x180] sm:$0xff]  ;;  %v1942_v22 = vld [vmem:[#allocation4 + $0x198] sm:$0xff]  ;;  %v1944_v23 = vld [vmem:[#allocation4 + $0x190] sm:$0xff] }
   0xd   :  { %v1948_v24 = vld [vmem:[#allocation4 + $0x160] sm:$0xff]  ;;  %v1950_v25 = vld [vmem:[#allocation4 + $0x168] sm:$0xff]  ;;  %v1954_v26 = vld [vmem:[#allocation4 + $0x178] sm:$0xff] }
   0xe   :  { %v65_v3 = vld.sshfl [vmem:[#allocation1] sm:$0xff pattern:$0x75316420]  ;;  %v66_v4 = vld.sshfl [vmem:[#allocation1 + $0x8] sm:$0xff pattern:$0x75316420] }
   0xf   :  { %1538 = vmatpush.msk.msra.mxu0 %vm94_vm0, %v65_v3  ;;  %1547 = vmatpush.msk.msra.mxu1 %vm94_vm0, %v66_v4  ;;  %v67_v5 = vld.sshfl [vmem:[#allocation1 + $0x10] sm:$0xff pattern:$0x75316420]  ;;  %v68_v6 = vld.sshfl [vmem:[#allocation1 + $0x18] sm:$0xff pattern:$0x75316420] }
  0x10   :  { %1556 = vmatpush.msk.msra.mxu2 %vm94_vm0, %v67_v5  ;;  %1565 = vmatpush.msk.msra.mxu3 %vm94_vm0, %v68_v6  ;;  %v1956_v27 = vld [vmem:[#allocation4 + $0x170] sm:$0xff]  ;;  %v1959_v28 = vld [vmem:[#allocation4 + $0x140] sm:$0xff]  ;;  %v1961_v29 = vld [vmem:[#allocation4 + $0x148] sm:$0xff] }
  0x11   :  { %1539 = vmatmul.msk.f32.vlgmr.msra.gmra.mxu0 %vm69_vm1, %v40_v2  ;;  %1548 = vmatmul.msk.f32.vlgmr.msra.gmra.mxu1 %vm69_vm1, %v40_v2  ;;  %v1966_v30 = vld [vmem:[#allocation4 + $0x158] sm:$0xff]  ;;  %v1968_v31 = vld [vmem:[#allocation4 + $0x150] sm:$0xff]  ;;  %v42_v32 = vld [vmem:[%s2848_s0 + $0x10] sm:$0xff] }
  0x12   :  { %1557 = vmatmul.msk.f32.vlgmr.msra.gmra.mxu2 %vm69_vm1, %v40_v2  ;;  %1566 = vmatmul.msk.f32.vlgmr.msra.gmra.mxu3 %vm69_vm1, %v40_v2  ;;  %v1977_v33 = vld [vmem:[#allocation4 + $0x120] sm:$0xff]  ;;  %v1979_v34 = vld [vmem:[#allocation4 + $0x128] sm:$0xff]  ;;  %v1985_v35 = vld [vmem:[#allocation4 + $0x138] sm:$0xff] }
  0x13   :  { %333 = vmatpush.msrb.mxu0 %v1893_v7  ;;  %353 = vmatpush.msrb.mxu1 %v1895_v8  ;;  %v1987_v36 = vld [vmem:[#allocation4 + $0x130] sm:$0xff]  ;;  %v1991_v37 = vld [vmem:[#allocation4 + $0x100] sm:$0xff]  ;;  %v1993_v38 = vld [vmem:[#allocation4 + $0x108] sm:$0xff] }
  0x14   :  { %393 = vmatpush.msrb.mxu3 %v1899_v9  ;;  %373 = vmatpush.msrb.mxu2 %v1901_v10  ;;  %v1997_v39 = vld [vmem:[#allocation4 + $0x118] sm:$0xff]  ;;  %v1999_v40 = vld [vmem:[#allocation4 + $0x110] sm:$0xff]  ;;  %v2002_v41 = vld [vmem:[#allocation4 + $0xe0] sm:$0xff] }
  0x15   :  { %334 = vmatpush.msrb.mxu0 %v1905_v11  ;;  %354 = vmatpush.msrb.mxu1 %v1907_v12  ;;  %v2004_v42 = vld [vmem:[#allocation4 + $0xe8] sm:$0xff]  ;;  %v2009_v43 = vld [vmem:[#allocation4 + $0xf8] sm:$0xff]  ;;  %v2011_v44 = vld [vmem:[#allocation4 + $0xf0] sm:$0xff] }
  0x16   :  { %394 = vmatpush.msrb.mxu3 %v1911_v13  ;;  %374 = vmatpush.msrb.mxu2 %v1913_v14  ;;  %v43_v45 = vld [vmem:[%s2848_s0 + $0x18] sm:$0xff]  ;;  %v2020_v46 = vld [vmem:[#allocation4 + $0xc0] sm:$0xff]  ;;  %v2022_v47 = vld [vmem:[#allocation4 + $0xc8] sm:$0xff] }
  0x17   :  { %335 = vmatpush.msrb.mxu0 %v1916_v15  ;;  %355 = vmatpush.msrb.mxu1 %v1918_v16  ;;  %v2028_v48 = vld [vmem:[#allocation4 + $0xd8] sm:$0xff]  ;;  %v2030_v49 = vld [vmem:[#allocation4 + $0xd0] sm:$0xff]  ;;  %v2034_v50 = vld [vmem:[#allocation4 + $0xa0] sm:$0xff] }
  0x18   :  { %395 = vmatpush.msrb.mxu3 %v1923_v17  ;;  %375 = vmatpush.msrb.mxu2 %v1925_v18  ;;  %2940 = vst [vmem:[#allocation10_spill] sm:$0xff] %v2028_v48  ;;  %v2036_v51 = vld [vmem:[#allocation4 + $0xa8] sm:$0xff]  ;;  %v2040_v52 = vld [vmem:[#allocation4 + $0xb8] sm:$0xff]  ;;  %v2042_v53 = vld [vmem:[#allocation4 + $0xb0] sm:$0xff] }
  0x19   :  { %1540 = vmatmul.msk.f32.gmra.mxu0 %vm69_vm1, %v41_v19  ;;  %1549 = vmatmul.msk.f32.gmra.mxu1 %vm69_vm1, %v41_v19  ;;  %2941 = vst [vmem:[#allocation11_spill] sm:$0xff] %v2030_v49  ;;  %v2045_v54 = vld [vmem:[#allocation4 + $0x80] sm:$0xff]  ;;  %v2047_v55 = vld [vmem:[#allocation4 + $0x88] sm:$0xff]  ;;  %v2052_v56 = vld [vmem:[#allocation4 + $0x98] sm:$0xff] }
  0x1a   :  { %1558 = vmatmul.msk.f32.gmra.mxu2 %vm69_vm1, %v41_v19  ;;  %1567 = vmatmul.msk.f32.gmra.mxu3 %vm69_vm1, %v41_v19  ;;  %2942 = vst [vmem:[#allocation12_spill] sm:$0xff] %v2034_v50  ;;  %v2054_v57 = vld [vmem:[#allocation4 + $0x90] sm:$0xff]  ;;  %v44_v58 = vld [vmem:[%s2848_s0 + $0x20] sm:$0xff]  ;;  %v2063_v59 = vld [vmem:[#allocation4 + $0x60] sm:$0xff] }
  0x1b   :  { %336 = vmatpush.msrb.mxu0 %v1934_v20  ;;  %356 = vmatpush.msrb.mxu1 %v1936_v21  ;;  %2943 = vst [vmem:[#allocation13_spill] sm:$0xff] %v2036_v51  ;;  %v2065_v60 = vld [vmem:[#allocation4 + $0x68] sm:$0xff]  ;;  %v2071_v61 = vld [vmem:[#allocation4 + $0x78] sm:$0xff]  ;;  %v2073_v62 = vld [vmem:[#allocation4 + $0x70] sm:$0xff] }
  0x1c   :  { %396 = vmatpush.msrb.mxu3 %v1942_v22  ;;  %376 = vmatpush.msrb.mxu2 %v1944_v23  ;;  %2944 = vst [vmem:[#allocation14_spill] sm:$0xff] %v2040_v52  ;;  %v2077_v63 = vld [vmem:[#allocation4 + $0x40] sm:$0xff]  ;;  %v2079_v0 = vld [vmem:[#allocation4 + $0x48] sm:$0xff]  ;;  %v2083_v1 = vld [vmem:[#allocation4 + $0x58] sm:$0xff] }
  0x1d   :  { %337 = vmatpush.msrb.mxu0 %v1948_v24  ;;  %357 = vmatpush.msrb.mxu1 %v1950_v25  ;;  %2945 = vst [vmem:[#allocation15_spill] sm:$0xff] %v2042_v53  ;;  %v2085_v2 = vld [vmem:[#allocation4 + $0x50] sm:$0xff]  ;;  %v2088_v3 = vld [vmem:[#allocation4 + $0x20] sm:$0xff]  ;;  %v2090_v4 = vld [vmem:[#allocation4 + $0x28] sm:$0xff] }
  0x1e   :  { %397 = vmatpush.msrb.mxu3 %v1954_v26  ;;  %377 = vmatpush.msrb.mxu2 %v1956_v27  ;;  %2946 = vst [vmem:[#allocation16_spill] sm:$0xff] %v2045_v54  ;;  %v2095_v5 = vld [vmem:[#allocation4 + $0x30] sm:$0xff]  ;;  %v2097_v6 = vld [vmem:[#allocation4 + $0x38] sm:$0xff]  ;;  %v45_v19 = vld [vmem:[%s2848_s0 + $0x28] sm:$0xff] }
  0x1f   :  { %338 = vmatpush.msrb.mxu0 %v1959_v28  ;;  %358 = vmatpush.msrb.mxu1 %v1961_v29  ;;  %2947 = vst [vmem:[#allocation17_spill] sm:$0xff] %v2047_v55 }
  0x20   :  { %398 = vmatpush.msrb.mxu3 %v1966_v30  ;;  %378 = vmatpush.msrb.mxu2 %v1968_v31  ;;  %2948 = vst [vmem:[#allocation18_spill] sm:$0xff] %v2052_v56 }
  0x21   :  { %1541 = vmatmul.msk.f32.gmra.mxu0 %vm69_vm1, %v42_v32  ;;  %1550 = vmatmul.msk.f32.gmra.mxu1 %vm69_vm1, %v42_v32  ;;  %2949 = vst [vmem:[#allocation19_spill] sm:$0xff] %v2054_v57 }
  0x22   :  { %1559 = vmatmul.msk.f32.gmra.mxu2 %vm69_vm1, %v42_v32  ;;  %1568 = vmatmul.msk.f32.gmra.mxu3 %vm69_vm1, %v42_v32  ;;  %2950 = vst [vmem:[#allocation20_spill] sm:$0xff] %v2063_v59  ;;  %v2106_v32 = vld [vmem:[#allocation4] sm:$0xff] }
  0x23   :  { %339 = vmatpush.msrb.mxu0 %v1977_v33  ;;  %359 = vmatpush.msrb.mxu1 %v1979_v34  ;;  %2951 = vst [vmem:[#allocation21_spill] sm:$0xff] %v2065_v60 }
  0x24   :  { %399 = vmatpush.msrb.mxu3 %v1985_v35  ;;  %379 = vmatpush.msrb.mxu2 %v1987_v36  ;;  %2952 = vst [vmem:[#allocation22_spill] sm:$0xff] %v2071_v61 }
  0x25   :  { %340 = vmatpush.msrb.mxu0 %v1991_v37  ;;  %360 = vmatpush.msrb.mxu1 %v1993_v38  ;;  %2953 = vst [vmem:[#allocation23_spill] sm:$0xff] %v2073_v62 }
  0x26   :  { %400 = vmatpush.msrb.mxu3 %v1997_v39  ;;  %380 = vmatpush.msrb.mxu2 %v1999_v40  ;;  %2954 = vst [vmem:[#allocation24_spill] sm:$0xff] %v2077_v63 }
  0x27   :  { %341 = vmatpush.msrb.mxu0 %v2002_v41  ;;  %361 = vmatpush.msrb.mxu1 %v2004_v42  ;;  %2955 = vst [vmem:[#allocation25_spill] sm:$0xff] %v2079_v0 }
  0x28   :  { %401 = vmatpush.msrb.mxu3 %v2009_v43  ;;  %381 = vmatpush.msrb.mxu2 %v2011_v44  ;;  %2956 = vst [vmem:[#allocation26_spill] sm:$0xff] %v2083_v1 }
  0x29   :  { %1542 = vmatmul.msk.f32.gmra.mxu0 %vm69_vm1, %v43_v45  ;;  %1551 = vmatmul.msk.f32.gmra.mxu1 %vm69_vm1, %v43_v45  ;;  %2957 = vst [vmem:[#allocation27_spill] sm:$0xff] %v2085_v2 }
  0x2a   :  { %1560 = vmatmul.msk.f32.gmra.mxu2 %vm69_vm1, %v43_v45  ;;  %1569 = vmatmul.msk.f32.gmra.mxu3 %vm69_vm1, %v43_v45  ;;  %2958 = vst [vmem:[#allocation28_spill] sm:$0xff] %v2088_v3  ;;  %v2108_v45 = vld [vmem:[#allocation4 + $0x8] sm:$0xff] }
  0x2b   :  { %342 = vmatpush.msrb.mxu0 %v2020_v46  ;;  %362 = vmatpush.msrb.mxu1 %v2022_v47  ;;  %2959 = vst [vmem:[#allocation29_spill] sm:$0xff] %v2090_v4 }
  0x2c   :  { %402 = vmatpush.msrb.mxu3 %v2028_v48  ;;  %382 = vmatpush.msrb.mxu2 %v2030_v49  ;;  %2960 = vst [vmem:[#allocation30_spill] sm:$0xff] %v2095_v5 }
  0x2d   :  { %343 = vmatpush.msrb.mxu0 %v2034_v50  ;;  %363 = vmatpush.msrb.mxu1 %v2036_v51  ;;  %2961 = vst [vmem:[#allocation31_spill] sm:$0xff] %v2097_v6 }
  0x2e   :  { %403 = vmatpush.msrb.mxu3 %v2040_v52  ;;  %383 = vmatpush.msrb.mxu2 %v2042_v53  ;;  %2962 = vst [vmem:[#allocation32_spill] sm:$0xff] %v2106_v32 }
  0x2f   :  { %344 = vmatpush.msrb.mxu0 %v2045_v54  ;;  %364 = vmatpush.msrb.mxu1 %v2047_v55  ;;  %2963 = vst [vmem:[#allocation33_spill] sm:$0xff] %v2108_v45 }
  0x30   :  { %404 = vmatpush.msrb.mxu3 %v2052_v56  ;;  %384 = vmatpush.msrb.mxu2 %v2054_v57 }
  0x31   :  { %1543 = vmatmul.msk.f32.gmra.mxu0 %vm69_vm1, %v44_v58  ;;  %1552 = vmatmul.msk.f32.gmra.mxu1 %vm69_vm1, %v44_v58 }
  0x32   :  { %1561 = vmatmul.msk.f32.gmra.mxu2 %vm69_vm1, %v44_v58  ;;  %1570 = vmatmul.msk.f32.gmra.mxu3 %vm69_vm1, %v44_v58  ;;  %v2114_v58 = vld [vmem:[#allocation4 + $0x10] sm:$0xff] }
  0x33   :  { %345 = vmatpush.msrb.mxu0 %v2063_v59  ;;  %365 = vmatpush.msrb.mxu1 %v2065_v60  ;;  %2964 = vst [vmem:[#allocation34_spill] sm:$0xff] %v2114_v58 }
  0x34   :  { %405 = vmatpush.msrb.mxu3 %v2071_v61  ;;  %385 = vmatpush.msrb.mxu2 %v2073_v62 }
  0x35   :  { %346 = vmatpush.msrb.mxu0 %v2077_v63  ;;  %366 = vmatpush.msrb.mxu1 %v2079_v0 }
  0x36   :  { %406 = vmatpush.msrb.mxu3 %v2083_v1  ;;  %386 = vmatpush.msrb.mxu2 %v2085_v2  ;;  %v2116_v1 = vld [vmem:[#allocation4 + $0x18] sm:$0xff] }
  0x37   :  { %347 = vmatpush.msrb.mxu0 %v2088_v3  ;;  %367 = vmatpush.msrb.mxu1 %v2090_v4  ;;  %2965 = vst [vmem:[#allocation35_spill] sm:$0xff] %v2116_v1 }
  0x38   :  { %387 = vmatpush.msrb.mxu2 %v2095_v5  ;;  %407 = vmatpush.msrb.mxu3 %v2097_v6  ;;  %v46_v6 = vld [vmem:[%s2848_s0 + $0x30] sm:$0xff] }
  0x39   :  { %1544 = vmatmul.msk.f32.gmra.mxu0 %vm69_vm1, %v45_v19  ;;  %1553 = vmatmul.msk.f32.gmra.mxu1 %vm69_vm1, %v45_v19 }
  0x3a   :  { %1562 = vmatmul.msk.f32.gmra.mxu2 %vm69_vm1, %v45_v19  ;;  %1571 = vmatmul.msk.f32.gmra.mxu3 %vm69_vm1, %v45_v19  ;;  %v47_v19 = vld [vmem:[%s2848_s0 + $0x38] sm:$0xff] }
  0x3b   :  { %348 = vmatpush.msrb.mxu0 %v2106_v32  ;;  %368 = vmatpush.msrb.mxu1 %v2108_v45 }
  0x3c   :  { %388 = vmatpush.msrb.mxu2 %v2114_v58  ;;  %408 = vmatpush.msrb.mxu3 %v2116_v1 }
  0x3d   :  { %481 = vmatpush.msra.mxu0 %v1893_v7  ;;  %501 = vmatpush.msra.mxu1 %v1895_v8 }
  0x3e   :  { %521 = vmatpush.msra.mxu2 %v1901_v10  ;;  %541 = vmatpush.msra.mxu3 %v1899_v9 }
  0x3f   :  { %482 = vmatpush.msra.mxu0 %v1905_v11  ;;  %502 = vmatpush.msra.mxu1 %v1907_v12 }
  0x40   :  { %522 = vmatpush.msra.mxu2 %v1913_v14  ;;  %542 = vmatpush.msra.mxu3 %v1911_v13 }
  0x41   :  { %1545 = vmatmul.msk.f32.gmra.mxu0 %vm69_vm1, %v46_v6  ;;  %1554 = vmatmul.msk.f32.gmra.mxu1 %vm69_vm1, %v46_v6 }
  0x42   :  { %1563 = vmatmul.msk.f32.gmra.mxu2 %vm69_vm1, %v46_v6  ;;  %1572 = vmatmul.msk.f32.gmra.mxu3 %vm69_vm1, %v46_v6  ;;  %v1852_v6 = vmov 0.0  }
  0x43   :  { %483 = vmatpush.msra.mxu0 %v1916_v15  ;;  %503 = vmatpush.msra.mxu1 %v1918_v16 }
  0x44   :  { %523 = vmatpush.msra.mxu2 %v1925_v18  ;;  %543 = vmatpush.msra.mxu3 %v1923_v17 }
  0x45   :  { %484 = vmatpush.msra.mxu0 %v1934_v20  ;;  %504 = vmatpush.msra.mxu1 %v1936_v21 }
  0x46   :  { %524 = vmatpush.msra.mxu2 %v1944_v23  ;;  %544 = vmatpush.msra.mxu3 %v1942_v22 }
  0x47   :  { %485 = vmatpush.msra.mxu0 %v1948_v24  ;;  %505 = vmatpush.msra.mxu1 %v1950_v25 }
  0x48   :  { %525 = vmatpush.msra.mxu2 %v1956_v27  ;;  %545 = vmatpush.msra.mxu3 %v1954_v26 }
  0x49   :  { %1546 = vmatmul.msk.f32.gmra.mxu0 %vm69_vm1, %v47_v19  ;;  %1555 = vmatmul.msk.f32.gmra.mxu1 %vm69_vm1, %v47_v19 }
  0x4a   :  { %1564 = vmatmul.msk.f32.gmra.mxu2 %vm69_vm1, %v47_v19  ;;  %1573 = vmatmul.msk.f32.gmra.mxu3 %vm69_vm1, %v47_v19  ;;  %v2966_v19 = vld [vmem:[#allocation26_spill] sm:$0xff] }
  0x4b   :  { %486 = vmatpush.msra.mxu0 %v1959_v28  ;;  %506 = vmatpush.msra.mxu1 %v1961_v29 }
  0x4c   :  { %526 = vmatpush.msra.mxu2 %v1968_v31  ;;  %546 = vmatpush.msra.mxu3 %v1966_v30 }
  0x4d   :  { %487 = vmatpush.msra.mxu0 %v1977_v33  ;;  %507 = vmatpush.msra.mxu1 %v1979_v34 }
  0x4e   :  { %527 = vmatpush.msra.mxu2 %v1987_v36  ;;  %547 = vmatpush.msra.mxu3 %v1985_v35 }
  0x4f   :  { %488 = vmatpush.msra.mxu0 %v1991_v37  ;;  %508 = vmatpush.msra.mxu1 %v1993_v38 }
  0x50   :  { %528 = vmatpush.msra.mxu2 %v1999_v40  ;;  %548 = vmatpush.msra.mxu3 %v1997_v39 }
  0x51   :  { %349 = vmatmul.f32.vlgmr.msrb.gmra.mxu0 %v1852_v6  ;;  %369 = vmatmul.f32.vlgmr.msrb.gmra.mxu1 %v1852_v6 }
  0x52   :  { %389 = vmatmul.f32.vlgmr.msrb.gmra.mxu2 %v1852_v6  ;;  %409 = vmatmul.f32.vlgmr.msrb.gmra.mxu3 %v1852_v6  ;;  %v2967_v6 = vld [vmem:[#allocation31_spill] sm:$0xff] }
  0x53   :  { %489 = vmatpush.msra.mxu0 %v2002_v41  ;;  %509 = vmatpush.msra.mxu1 %v2004_v42 }
  0x54   :  { %529 = vmatpush.msra.mxu2 %v2011_v44  ;;  %549 = vmatpush.msra.mxu3 %v2009_v43 }
  0x55   :  { %490 = vmatpush.msra.mxu0 %v2020_v46  ;;  %510 = vmatpush.msra.mxu1 %v2022_v47 }
  0x56   :  { %530 = vmatpush.msra.mxu2 %v2030_v49  ;;  %550 = vmatpush.msra.mxu3 %v2028_v48 }
  0x57   :  { %491 = vmatpush.msra.mxu0 %v2034_v50  ;;  %511 = vmatpush.msra.mxu1 %v2036_v51 }
  0x58   :  { %531 = vmatpush.msra.mxu2 %v2042_v53  ;;  %551 = vmatpush.msra.mxu3 %v2040_v52 }
  0x59   :  { %492 = vmatpush.msra.mxu0 %v2045_v54  ;;  %512 = vmatpush.msra.mxu1 %v2047_v55 }
  0x5a   :  { %532 = vmatpush.msra.mxu2 %v2054_v57  ;;  %552 = vmatpush.msra.mxu3 %v2052_v56 }
  0x5b   :  { %493 = vmatpush.msra.mxu0 %v2063_v59  ;;  %513 = vmatpush.msra.mxu1 %v2065_v60 }
  0x5c   :  { %533 = vmatpush.msra.mxu2 %v2073_v62  ;;  %553 = vmatpush.msra.mxu3 %v2071_v61 }
  0x5d   :  { %494 = vmatpush.msra.mxu0 %v2077_v63  ;;  %514 = vmatpush.msra.mxu1 %v2079_v0 }
  0x5e   :  { %534 = vmatpush.msra.mxu2 %v2085_v2  ;;  %554 = vmatpush.msra.mxu3 %v2966_v19 }
  0x5f   :  { %495 = vmatpush.msra.mxu0 %v2088_v3  ;;  %515 = vmatpush.msra.mxu1 %v2090_v4 }
  0x60   :  { %535 = vmatpush.msra.mxu2 %v2095_v5  ;;  %555 = vmatpush.msra.mxu3 %v2967_v6 }
  0x61   :  { %496 = vmatpush.msra.mxu0 %v2106_v32  ;;  %516 = vmatpush.msra.mxu1 %v2108_v45 }
  0x62   :  { %536 = vmatpush.msra.mxu2 %v2114_v58  ;;  %556 = vmatpush.msra.mxu3 %v2116_v1 }
  0x63   :  { %629 = vmatpush.msrb.mxu0 %v1893_v7  ;;  %649 = vmatpush.msrb.mxu1 %v1895_v8 }
  0x64   :  { %669 = vmatpush.msrb.mxu2 %v1901_v10  ;;  %689 = vmatpush.msrb.mxu3 %v1899_v9 }
  0x65   :  { %630 = vmatpush.msrb.mxu0 %v1905_v11  ;;  %650 = vmatpush.msrb.mxu1 %v1907_v12 }
  0x66   :  { %670 = vmatpush.msrb.mxu2 %v1913_v14  ;;  %690 = vmatpush.msrb.mxu3 %v1911_v13 }
  0x67   :  { %631 = vmatpush.msrb.mxu0 %v1916_v15  ;;  %651 = vmatpush.msrb.mxu1 %v1918_v16 }
  0x68   :  { %671 = vmatpush.msrb.mxu2 %v1925_v18  ;;  %691 = vmatpush.msrb.mxu3 %v1923_v17 }
  0x69   :  { %632 = vmatpush.msrb.mxu0 %v1934_v20  ;;  %652 = vmatpush.msrb.mxu1 %v1936_v21 }
  0x6a   :  { %672 = vmatpush.msrb.mxu2 %v1944_v23  ;;  %692 = vmatpush.msrb.mxu3 %v1942_v22 }
  0x6b   :  { %633 = vmatpush.msrb.mxu0 %v1948_v24  ;;  %653 = vmatpush.msrb.mxu1 %v1950_v25 }
  0x6c   :  { %673 = vmatpush.msrb.mxu2 %v1956_v27  ;;  %693 = vmatpush.msrb.mxu3 %v1954_v26 }
  0x6d   :  { %634 = vmatpush.msrb.mxu0 %v1959_v28  ;;  %654 = vmatpush.msrb.mxu1 %v1961_v29 }
  0x6e   :  { %674 = vmatpush.msrb.mxu2 %v1968_v31  ;;  %694 = vmatpush.msrb.mxu3 %v1966_v30 }
  0x6f   :  { %635 = vmatpush.msrb.mxu0 %v1977_v33  ;;  %655 = vmatpush.msrb.mxu1 %v1979_v34 }
  0x70   :  { %675 = vmatpush.msrb.mxu2 %v1987_v36  ;;  %695 = vmatpush.msrb.mxu3 %v1985_v35 }
  0x71   :  { %636 = vmatpush.msrb.mxu0 %v1991_v37  ;;  %656 = vmatpush.msrb.mxu1 %v1993_v38 }
  0x72   :  { %676 = vmatpush.msrb.mxu2 %v1999_v40  ;;  %696 = vmatpush.msrb.mxu3 %v1997_v39 }
  0x73   :  { %637 = vmatpush.msrb.mxu0 %v2002_v41  ;;  %657 = vmatpush.msrb.mxu1 %v2004_v42 }
  0x74   :  { %677 = vmatpush.msrb.mxu2 %v2011_v44  ;;  %697 = vmatpush.msrb.mxu3 %v2009_v43 }
  0x75   :  { %638 = vmatpush.msrb.mxu0 %v2020_v46  ;;  %658 = vmatpush.msrb.mxu1 %v2022_v47 }
  0x76   :  { %678 = vmatpush.msrb.mxu2 %v2030_v49  ;;  %698 = vmatpush.msrb.mxu3 %v2028_v48 }
  0x77   :  { %639 = vmatpush.msrb.mxu0 %v2034_v50  ;;  %659 = vmatpush.msrb.mxu1 %v2036_v51 }
  0x78   :  { %679 = vmatpush.msrb.mxu2 %v2042_v53  ;;  %699 = vmatpush.msrb.mxu3 %v2040_v52 }
  0x79   :  { %640 = vmatpush.msrb.mxu0 %v2045_v54  ;;  %660 = vmatpush.msrb.mxu1 %v2047_v55 }
  0x7a   :  { %680 = vmatpush.msrb.mxu2 %v2054_v57  ;;  %700 = vmatpush.msrb.mxu3 %v2052_v56 }
  0x7b   :  { %641 = vmatpush.msrb.mxu0 %v2063_v59  ;;  %661 = vmatpush.msrb.mxu1 %v2065_v60 }
  0x7c   :  { %681 = vmatpush.msrb.mxu2 %v2073_v62  ;;  %701 = vmatpush.msrb.mxu3 %v2071_v61 }
  0x7d   :  { %642 = vmatpush.msrb.mxu0 %v2077_v63  ;;  %662 = vmatpush.msrb.mxu1 %v2079_v0 }
  0x7e   :  { %682 = vmatpush.msrb.mxu2 %v2085_v2  ;;  %702 = vmatpush.msrb.mxu3 %v2966_v19 }
  0x7f   :  { %643 = vmatpush.msrb.mxu0 %v2088_v3  ;;  %663 = vmatpush.msrb.mxu1 %v2090_v4  ;;  %v50_v3 = vld [vmem:[%s2851_s3] sm:$0xf]  ;;  %s1853_s3 = smov [#allocation7]  }
  0x80   :  { %683 = vmatpush.msrb.mxu2 %v2095_v5  ;;  %703 = vmatpush.msrb.mxu3 %v2967_v6  ;;  %v52_v19 = vperm.slane %v50_v3, 0  ;;  %v53_v4 = vperm.slane %v50_v3, 1  ;;  %s1523_s15 = sshll.u32 %s1853_s3, 4  ;;  %s1524_s15 = int_to_ptr.vmem [resolvable:$true] %s1523_s15 }
  0x81   :  { %644 = vmatpush.msrb.mxu0 %v2106_v32  ;;  %664 = vmatpush.msrb.mxu1 %v2108_v45 }
  0x82   :  { %684 = vmatpush.msrb.mxu2 %v2114_v58  ;;  %704 = vmatpush.msrb.mxu3 %v2116_v1  ;;  %v2277_v58 = vperm.slane %v50_v3, 2  ;;  %v55_v1 = vperm.slane %v50_v3, 3 }
  0x8e   :  { %v120_v0 = vpop.f32.mrf.mxu0  ;;  %v161_v2 = vpop.f32.mrf.mxu1 }
  0x95   :  { %v2269_v63 = vpop.f32.mrf.mxu2  ;;  %v2271_v5 = vpop.f32.mrf.mxu3 }
  0x96   :  { %v123_v6 = vpop.f32.mrf.mxu0  ;;  %v164_v32 = vpop.f32.mrf.mxu1 }
  0x97   :  { %v2273_v61 = vadd.f32 %v123_v6, %v52_v19  ;;  %v2275_v45 = vadd.f32 %v164_v32, %v53_v4 }
  0x99   :  { %2968 = vst [vmem:[#allocation36_spill] sm:$0xff] %v2273_v61 }
  0x9a   :  { %2969 = vst [vmem:[#allocation37_spill] sm:$0xff] %v2275_v45 }
  0x9d   :  { %v205_v62 = vpop.f32.mrf.mxu2  ;;  %v246_v60 = vpop.f32.mrf.mxu3 }
  0x9e   :  { %v2280_v59 = vadd.f32 %v205_v62, %v2277_v58  ;;  %v2282_v56 = vadd.f32 %v246_v60, %v55_v1  ;;  %v126_v57 = vpop.f32.mrf.mxu0  ;;  %v167_v55 = vpop.f32.mrf.mxu1 }
  0x9f   :  { %v2284_v54 = vadd.f32 %v126_v57, %v52_v19  ;;  %v2286_v52 = vadd.f32 %v167_v55, %v53_v4 }
  0xa0   :  { %2970 = vst [vmem:[#allocation38_spill] sm:$0xff] %v2280_v59 }
  0xa1   :  { %2971 = vst [vmem:[#allocation39_spill] sm:$0xff] %v2282_v56 }
  0xa2   :  { %2972 = vst [vmem:[#allocation40_spill] sm:$0xff] %v2284_v54 }
  0xa3   :  { %2973 = vst [vmem:[#allocation41_spill] sm:$0xff] %v2286_v52 }
  0xa5   :  { %v208_v6 = vpop.f32.mrf.mxu2  ;;  %v249_v61 = vpop.f32.mrf.mxu3 }
  0xa6   :  { %v2289_v32 = vadd.f32 %v208_v6, %v2277_v58  ;;  %v2291_v45 = vadd.f32 %v249_v61, %v55_v1  ;;  %v129_v3 = vpop.f32.mrf.mxu0  ;;  %v170_v53 = vpop.f32.mrf.mxu1 }
  0xa7   :  { %v2293_v51 = vadd.f32 %v129_v3, %v52_v19  ;;  %v2295_v62 = vadd.f32 %v170_v53, %v53_v4 }
  0xa8   :  { %2974 = vst [vmem:[#allocation42_spill] sm:$0xff] %v2289_v32 }
  0xa9   :  { %2975 = vst [vmem:[#allocation43_spill] sm:$0xff] %v2291_v45 }
  0xaa   :  { %2976 = vst [vmem:[#allocation44_spill] sm:$0xff] %v2293_v51 }
  0xab   :  { %2977 = vst [vmem:[#allocation45_spill] sm:$0xff] %v2295_v62 }
  0xad   :  { %v211_v60 = vpop.f32.mrf.mxu2  ;;  %v252_v59 = vpop.f32.mrf.mxu3 }
  0xae   :  { %v2298_v57 = vadd.f32 %v211_v60, %v2277_v58  ;;  %v2300_v55 = vadd.f32 %v252_v59, %v55_v1  ;;  %v132_v52 = vpop.f32.mrf.mxu0  ;;  %v173_v54 = vpop.f32.mrf.mxu1 }
  0xaf   :  { %v2302_v56 = vadd.f32 %v132_v52, %v52_v19  ;;  %v2304_v6 = vadd.f32 %v173_v54, %v53_v4 }
  0xb0   :  { %2978 = vst [vmem:[#allocation46_spill] sm:$0xff] %v2298_v57 }
  0xb1   :  { %2979 = vst [vmem:[#allocation47_spill] sm:$0xff] %v2300_v55 }
  0xb2   :  { %2980 = vst [vmem:[#allocation48_spill] sm:$0xff] %v2302_v56 }
  0xb3   :  { %2981 = vst [vmem:[#allocation49_spill] sm:$0xff] %v2304_v6 }
  0xb5   :  { %v214_v61 = vpop.f32.mrf.mxu2  ;;  %v255_v32 = vpop.f32.mrf.mxu3 }
  0xb6   :  { %v2307_v3 = vadd.f32 %v214_v61, %v2277_v58  ;;  %v2309_v53 = vadd.f32 %v255_v32, %v55_v1  ;;  %v135_v62 = vpop.f32.mrf.mxu0  ;;  %v176_v51 = vpop.f32.mrf.mxu1 }
  0xb7   :  { %v2311_v45 = vadd.f32 %v135_v62, %v52_v19  ;;  %v2313_v60 = vadd.f32 %v176_v51, %v53_v4 }
  0xb8   :  { %2982 = vst [vmem:[#allocation50_spill] sm:$0xff] %v2307_v3 }
  0xb9   :  { %2983 = vst [vmem:[#allocation51_spill] sm:$0xff] %v2309_v53 }
  0xba   :  { %2984 = vst [vmem:[#allocation52_spill] sm:$0xff] %v2311_v45 }
  0xbb   :  { %2985 = vst [vmem:[#allocation53_spill] sm:$0xff] %v2313_v60 }
  0xbd   :  { %v217_v59 = vpop.f32.mrf.mxu2  ;;  %v258_v57 = vpop.f32.mrf.mxu3 }
  0xbe   :  { %v2316_v52 = vadd.f32 %v217_v59, %v2277_v58  ;;  %v2318_v54 = vadd.f32 %v258_v57, %v55_v1  ;;  %v138_v6 = vpop.f32.mrf.mxu0  ;;  %v179_v56 = vpop.f32.mrf.mxu1  ;;  %v121_v57 = vadd.f32 %v120_v0, %v52_v19 }
  0xbf   :  { %v2320_v55 = vadd.f32 %v138_v6, %v52_v19  ;;  %v2322_v61 = vadd.f32 %v179_v56, %v53_v4 }
  0xc0   :  { %2986 = vst [vmem:[#allocation54_spill] sm:$0xff] %v2316_v52  ;;  %v162_v52 = vadd.f32 %v161_v2, %v53_v4 }
  0xc1   :  { %2987 = vst [vmem:[#allocation55_spill] sm:$0xff] %v2318_v54 }
  0xc2   :  { %2988 = vst [vmem:[#allocation56_spill] sm:$0xff] %v2320_v55 }
  0xc3   :  { %2989 = vst [vmem:[#allocation57_spill] sm:$0xff] %v2322_v61 }
  0xc5   :  { %v220_v32 = vpop.f32.mrf.mxu2  ;;  %v261_v3 = vpop.f32.mrf.mxu3 }
  0xc6   :  { %v2325_v62 = vadd.f32 %v220_v32, %v2277_v58  ;;  %v2327_v51 = vadd.f32 %v261_v3, %v55_v1  ;;  %v141_v60 = vpop.f32.mrf.mxu0  ;;  %v182_v45 = vpop.f32.mrf.mxu1 }
  0xc7   :  { %v2329_v53 = vadd.f32 %v141_v60, %v52_v19  ;;  %v2331_v59 = vadd.f32 %v182_v45, %v53_v4  ;;  %v244_v60 = vadd.f32 %v2271_v5, %v55_v1 }
  0xc8   :  { %2990 = vst [vmem:[#allocation58_spill] sm:$0xff] %v2325_v62 }
  0xc9   :  { %2991 = vst [vmem:[#allocation59_spill] sm:$0xff] %v2327_v51 }
  0xca   :  { %2992 = vst [vmem:[#allocation60_spill] sm:$0xff] %v2329_v53 }
  0xcb   :  { %2993 = vst [vmem:[#allocation61_spill] sm:$0xff] %v2331_v59 }
  0xcd   :  { %v223_v54 = vpop.f32.mrf.mxu2  ;;  %v264_v6 = vpop.f32.mrf.mxu3 }
  0xce   :  { %v2334_v56 = vadd.f32 %v223_v54, %v2277_v58  ;;  %v2336_v61 = vadd.f32 %v264_v6, %v55_v1  ;;  %v350_v55 = vpop.f32.mrf.mxu0  ;;  %v370_v32 = vpop.f32.mrf.mxu1 }
  0xcf   :  { %v413_v62 = vadd.f32 %v350_v55, %v121_v57  ;;  %v414_v3 = vadd.f32 %v370_v32, %v162_v52  ;;  %v203_v55 = vadd.f32 %v2269_v63, %v2277_v58 }
  0xd0   :  { %2994 = vst [vmem:[#allocation62_spill] sm:$0xff] %v2334_v56 }
  0xd1   :  { %2995 = vst [vmem:[#allocation63_spill] sm:$0xff] %v2336_v61  ;;  %v1574_v51 = vmul.f32 -1.442695, %v413_v62  ;;  %v1575_v50 = vmul.f32 -1.442695, %v414_v3 }
  0xd3   :  { %1605 = vpow2.f32 %v1574_v51 }
  0xd4   :  { %1607 = vpow2.f32 %v1575_v50 }
  0xd5   :  { %v410_v45 = vpop.f32.mrf.mxu3  ;;  %v390_v6 = vpop.f32.mrf.mxu2 }
  0xd6   :  { %v416_v0 = vadd.f32 %v410_v45, %v244_v60  ;;  %v415_v51 = vadd.f32 %v390_v6, %v203_v55 }
  0xd8   :  { %v1576_v2 = vmul.f32 -1.442695, %v416_v0 }
  0xd9   :  { %v1606_v4 = vpop.eup %1605 }
  0xda   :  { %v1608_v19 = vpop.eup %1607  ;;  %v420_v59 = vadd.f32 1.0, %v1606_v4  ;;  %1609 = vpow2.f32 %v1576_v2 }
  0xdb   :  { %v439_v54 = vadd.f32 1.0, %v1608_v19 }
  0xdc   :  { %1611 = vrcp.f32 %v420_v59  ;;  %v432_v3 = vand.u32 2147483648, %v420_v59  ;;  %v430_v0 = vand.u32 2147483647, %v420_v59  ;;  %vm426_vm4 = vweird.f32 %v420_v59 }
  0xdd   :  { %1613 = vrcp.f32 %v439_v54  ;;  %v451_v60 = vand.u32 2147483648, %v439_v54  ;;  %v449_v4 = vand.u32 2147483647, %v439_v54  ;;  %vm445_vm5 = vweird.f32 %v439_v54 }
  0xde   :  { %v433_v58 = vor.u32 1.1754944e-38, %v432_v3  ;;  %vm431_vm7 = vcmp.eq.f32.partialorder %v430_v0, 8.507059e+37 }
  0xdf   :  { %v452_v55 = vor.u32 1.1754944e-38, %v451_v60  ;;  %vm450_vm9 = vcmp.eq.f32.partialorder %v449_v4, 8.507059e+37 }
  0xe0   :  { %v1610_v56 = vpop.eup %1609 }
  0xe1   :  { %v459_v52 = vadd.f32 1.0, %v1610_v56 }
  0xe2   :  { %v1612_v62 = vpop.eup %1611 }
  0xe3   :  { %v1614_v1 = vpop.eup %1613  ;;  %v422_v50 = vmul.f32 %v1612_v62, %v420_v59  ;;  %1615 = vrcp.f32 %v459_v52  ;;  %vm427_vm2 = vweird.f32 %v1612_v62  ;;  %vm465_vm11 = vweird.f32 %v459_v52 }
  0xe4   :  { %v441_v5 = vmul.f32 %v1614_v1, %v439_v54  ;;  %1617 = vtanh.f32 %v415_v51  ;;  %vm446_vm3 = vweird.f32 %v1614_v1  ;;  %vm428_vm6 = vmor %vm426_vm4, %vm427_vm2  ;;  %v471_v54 = vand.u32 2147483648, %v459_v52 }
  0xe5   :  { %v423_v57 = vsub.f32 1.0, %v422_v50  ;;  %vm447_vm8 = vmor %vm445_vm5, %vm446_vm3 }
  0xe6   :  { %v442_v32 = vsub.f32 1.0, %v441_v5  ;;  %v472_v60 = vor.u32 1.1754944e-38, %v471_v54 }
  0xe7   :  { %v424_v45 = vmul.f32 %v1612_v62, %v423_v57 }
  0xe8   :  { %v443_v2 = vmul.f32 %v1614_v1, %v442_v32 }
  0xe9   :  { %v1616_v19 = vpop.eup %1615  ;;  %v425_v63 = vadd.f32 %v1612_v62, %v424_v45 }
  0xea   :  { %v444_v56 = vadd.f32 %v1614_v1, %v443_v2  ;;  %v461_v6 = vmul.f32 %v1616_v19, %v459_v52  ;;  %v1618_v51 = vpop.eup %1617  ;;  %vm466_vm10 = vweird.f32 %v1616_v19 }
  0xeb   :  { %v429_v50 = vsel %vm428_vm6, %v1612_v62, %v425_v63  ;;  %v469_v62 = vand.u32 2147483647, %v459_v52  ;;  %vm467_vm12 = vmor %vm465_vm11, %vm466_vm10 }
  0xec   :  { %v434_v5 = vsel %vm431_vm7, %v433_v58, %v429_v50  ;;  %v448_v57 = vsel %vm447_vm8, %v1614_v1, %v444_v56  ;;  %v462_v61 = vsub.f32 1.0, %v461_v6  ;;  %v3025_v58 = vld [vmem:[#allocation38_spill] sm:$0xff] }
  0xed   :  { %v453_v32 = vsel %vm450_vm9, %v452_v55, %v448_v57  ;;  %v476_v53 = vmul.f32 %v1618_v51, %v434_v5  ;;  %vm470_vm13 = vcmp.eq.f32.partialorder %v469_v62, 8.507059e+37 }
  0xee   :  { %v475_v48 = vmul.f32 0.0, %v453_v32  ;;  %v463_v49 = vmul.f32 %v1616_v19, %v462_v61 }
  0xf0   :  { %v2341_v45 = vadd.f32 %v476_v53, %v475_v48  ;;  %v464_v59 = vadd.f32 %v1616_v19, %v463_v49 }
  0xf2   :  { %1619 = vtanh.f32 %v2341_v45  ;;  %v468_v3 = vsel %vm467_vm12, %v1616_v19, %v464_v59 }
  0xf3   :  { %v473_v0 = vsel %vm470_vm13, %v472_v60, %v468_v3 }
  0xf8   :  { %v1620_v1 = vpop.eup %1619 }
  0xf9   :  { %v479_v2 = vmul.f32 %v1620_v1, %v473_v0 }
  0xfb   :  { %480 = vst [vmem:[#allocation7] sm:$0xff] %v479_v2  ;;  %497 = vmatmul.f32.vlgmr.msra.gmra.mxu0 %v479_v2  ;;  %517 = vmatmul.f32.vlgmr.msra.gmra.mxu1 %v479_v2 }
  0xfc   :  { %537 = vmatmul.f32.vlgmr.msra.gmra.mxu2 %v479_v2  ;;  %557 = vmatmul.f32.vlgmr.msra.gmra.mxu3 %v479_v2 }
  0xfd   :  { %777 = vmatpush.msra.mxu0 %v1893_v7  ;;  %797 = vmatpush.msra.mxu1 %v1895_v8  ;;  %v2996_v7 = vld [vmem:[#allocation11_spill] sm:$0xff]  ;;  %v2997_v8 = vld [vmem:[#allocation10_spill] sm:$0xff] }
  0xfe   :  { %817 = vmatpush.msra.mxu2 %v1901_v10  ;;  %837 = vmatpush.msra.mxu3 %v1899_v9  ;;  %v2998_v9 = vld [vmem:[#allocation12_spill] sm:$0xff]  ;;  %v2999_v10 = vld [vmem:[#allocation13_spill] sm:$0xff] }
  0xff   :  { %778 = vmatpush.msra.mxu0 %v1905_v11  ;;  %798 = vmatpush.msra.mxu1 %v1907_v12  ;;  %v3000_v11 = vld [vmem:[#allocation15_spill] sm:$0xff]  ;;  %v3001_v12 = vld [vmem:[#allocation14_spill] sm:$0xff] }
 0x100   :  { %818 = vmatpush.msra.mxu2 %v1913_v14  ;;  %838 = vmatpush.msra.mxu3 %v1911_v13  ;;  %v3002_v13 = vld [vmem:[#allocation16_spill] sm:$0xff]  ;;  %v3003_v14 = vld [vmem:[#allocation17_spill] sm:$0xff] }
 0x101   :  { %779 = vmatpush.msra.mxu0 %v1916_v15  ;;  %799 = vmatpush.msra.mxu1 %v1918_v16  ;;  %v3004_v15 = vld [vmem:[#allocation19_spill] sm:$0xff]  ;;  %v3005_v16 = vld [vmem:[#allocation18_spill] sm:$0xff] }
 0x102   :  { %819 = vmatpush.msra.mxu2 %v1925_v18  ;;  %839 = vmatpush.msra.mxu3 %v1923_v17  ;;  %v3006_v17 = vld [vmem:[#allocation20_spill] sm:$0xff]  ;;  %v3007_v18 = vld [vmem:[#allocation21_spill] sm:$0xff] }
 0x103   :  { %780 = vmatpush.msra.mxu0 %v1934_v20  ;;  %800 = vmatpush.msra.mxu1 %v1936_v21  ;;  %v3008_v20 = vld [vmem:[#allocation23_spill] sm:$0xff]  ;;  %v3009_v21 = vld [vmem:[#allocation22_spill] sm:$0xff] }
 0x104   :  { %820 = vmatpush.msra.mxu2 %v1944_v23  ;;  %840 = vmatpush.msra.mxu3 %v1942_v22  ;;  %v3010_v22 = vld [vmem:[#allocation24_spill] sm:$0xff]  ;;  %v3011_v23 = vld [vmem:[#allocation25_spill] sm:$0xff] }
 0x105   :  { %781 = vmatpush.msra.mxu0 %v1948_v24  ;;  %801 = vmatpush.msra.mxu1 %v1950_v25  ;;  %v3012_v24 = vld [vmem:[#allocation27_spill] sm:$0xff]  ;;  %v3013_v25 = vld [vmem:[#allocation26_spill] sm:$0xff] }
 0x106   :  { %821 = vmatpush.msra.mxu2 %v1956_v27  ;;  %841 = vmatpush.msra.mxu3 %v1954_v26  ;;  %v3014_v26 = vld [vmem:[#allocation28_spill] sm:$0xff]  ;;  %v3015_v27 = vld [vmem:[#allocation29_spill] sm:$0xff] }
 0x107   :  { %782 = vmatpush.msra.mxu0 %v1959_v28  ;;  %802 = vmatpush.msra.mxu1 %v1961_v29  ;;  %v3016_v28 = vld [vmem:[#allocation30_spill] sm:$0xff]  ;;  %v3017_v29 = vld [vmem:[#allocation31_spill] sm:$0xff] }
 0x108   :  { %822 = vmatpush.msra.mxu2 %v1968_v31  ;;  %842 = vmatpush.msra.mxu3 %v1966_v30  ;;  %v3018_v30 = vld [vmem:[#allocation32_spill] sm:$0xff]  ;;  %v3019_v31 = vld [vmem:[#allocation33_spill] sm:$0xff] }
 0x109   :  { %783 = vmatpush.msra.mxu0 %v1977_v33  ;;  %803 = vmatpush.msra.mxu1 %v1979_v34  ;;  %v3020_v33 = vld [vmem:[#allocation34_spill] sm:$0xff]  ;;  %v3021_v34 = vld [vmem:[#allocation35_spill] sm:$0xff] }
 0x10a   :  { %823 = vmatpush.msra.mxu2 %v1987_v36  ;;  %843 = vmatpush.msra.mxu3 %v1985_v35 }
 0x10b   :  { %784 = vmatpush.msra.mxu0 %v1991_v37  ;;  %804 = vmatpush.msra.mxu1 %v1993_v38  ;;  %v3022_v37 = vld [vmem:[#allocation36_spill] sm:$0xff] }
 0x10c   :  { %824 = vmatpush.msra.mxu2 %v1999_v40  ;;  %844 = vmatpush.msra.mxu3 %v1997_v39  ;;  %v3023_v39 = vld [vmem:[#allocation37_spill] sm:$0xff] }
 0x10d   :  { %785 = vmatpush.msra.mxu0 %v2002_v41  ;;  %805 = vmatpush.msra.mxu1 %v2004_v42 }
 0x10e   :  { %825 = vmatpush.msra.mxu2 %v2011_v44  ;;  %845 = vmatpush.msra.mxu3 %v2009_v43  ;;  %v3024_v44 = vld [vmem:[#allocation39_spill] sm:$0xff] }
 0x10f   :  { %786 = vmatpush.msra.mxu0 %v2020_v46  ;;  %806 = vmatpush.msra.mxu1 %v2022_v47 }
 0x110   :  { %826 = vmatpush.msra.mxu2 %v2996_v7  ;;  %846 = vmatpush.msra.mxu3 %v2997_v8 }
 0x111   :  { %787 = vmatpush.msra.mxu0 %v2998_v9  ;;  %807 = vmatpush.msra.mxu1 %v2999_v10 }
 0x112   :  { %827 = vmatpush.msra.mxu2 %v3000_v11  ;;  %847 = vmatpush.msra.mxu3 %v3001_v12 }
 0x113   :  { %788 = vmatpush.msra.mxu0 %v3002_v13  ;;  %808 = vmatpush.msra.mxu1 %v3003_v14 }
 0x114   :  { %828 = vmatpush.msra.mxu2 %v3004_v15  ;;  %848 = vmatpush.msra.mxu3 %v3005_v16 }
 0x115   :  { %789 = vmatpush.msra.mxu0 %v3006_v17  ;;  %809 = vmatpush.msra.mxu1 %v3007_v18 }
 0x116   :  { %829 = vmatpush.msra.mxu2 %v3008_v20  ;;  %849 = vmatpush.msra.mxu3 %v3009_v21 }
 0x117   :  { %790 = vmatpush.msra.mxu0 %v3010_v22  ;;  %810 = vmatpush.msra.mxu1 %v3011_v23 }
 0x118   :  { %830 = vmatpush.msra.mxu2 %v3012_v24  ;;  %850 = vmatpush.msra.mxu3 %v3013_v25 }
 0x119   :  { %791 = vmatpush.msra.mxu0 %v3014_v26  ;;  %811 = vmatpush.msra.mxu1 %v3015_v27 }
 0x11a   :  { %831 = vmatpush.msra.mxu2 %v3016_v28  ;;  %851 = vmatpush.msra.mxu3 %v3017_v29 }
 0x11b   :  { %792 = vmatpush.msra.mxu0 %v3018_v30  ;;  %812 = vmatpush.msra.mxu1 %v3019_v31 }
 0x11c   :  { %832 = vmatpush.msra.mxu2 %v3020_v33  ;;  %852 = vmatpush.msra.mxu3 %v3021_v34 }
 0x178   :  { %v498_v35 = vpop.f32.mrf.mxu0  ;;  %v518_v36 = vpop.f32.mrf.mxu1 }
 0x179   :  { %v561_v38 = vadd.f32 %v498_v35, %v3022_v37  ;;  %v562_v40 = vadd.f32 %v518_v36, %v3023_v39  ;;  %v2419_v35 = vld [vmem:[#allocation4 + $0x1e8] sm:$0xff]  ;;  %v2422_v36 = vld [vmem:[#allocation4 + $0x1f0] sm:$0xff]  ;;  %v2425_v37 = vld [vmem:[#allocation4 + $0x1f8] sm:$0xff] }
 0x17a   :  { %v2431_v39 = vld [vmem:[#allocation4 + $0x1c8] sm:$0xff] }
 0x17b   :  { %v1577_v41 = vmul.f32 -1.442695, %v561_v38  ;;  %v1578_v42 = vmul.f32 -1.442695, %v562_v40  ;;  %v2428_v38 = vld [vmem:[#allocation4 + $0x1c0] sm:$0xff]  ;;  %v2434_v40 = vld [vmem:[#allocation4 + $0x1d0] sm:$0xff] }
 0x17d   :  { %1621 = vpow2.f32 %v1577_v41  ;;  %v2437_v41 = vld [vmem:[#allocation4 + $0x1d8] sm:$0xff] }
 0x17e   :  { %1623 = vpow2.f32 %v1578_v42  ;;  %v2440_v42 = vld [vmem:[#allocation4 + $0x1a0] sm:$0xff] }
 0x17f   :  { %v558_v43 = vpop.f32.mrf.mxu3  ;;  %v538_v52 = vpop.f32.mrf.mxu2 }
 0x180   :  { %v564_v46 = vadd.f32 %v558_v43, %v3024_v44  ;;  %v563_v56 = vadd.f32 %v538_v52, %v3025_v58  ;;  %v2443_v43 = vld [vmem:[#allocation4 + $0x1a8] sm:$0xff]  ;;  %v2446_v44 = vld [vmem:[#allocation4 + $0x1b0] sm:$0xff] }
 0x181   :  { %v2467_v52 = vld [vmem:[#allocation4 + $0x168] sm:$0xff] }
 0x182   :  { %v1579_v47 = vmul.f32 -1.442695, %v564_v46  ;;  %v2449_v46 = vld [vmem:[#allocation4 + $0x1b8] sm:$0xff]  ;;  %v2479_v58 = vld [vmem:[#allocation4 + $0x148] sm:$0xff] }
 0x183   :  { %v1622_v48 = vpop.eup %1621 }
 0x184   :  { %v1624_v49 = vpop.eup %1623  ;;  %v568_v53 = vadd.f32 1.0, %v1622_v48  ;;  %1625 = vpow2.f32 %v1579_v47  ;;  %v2452_v47 = vld [vmem:[#allocation4 + $0x180] sm:$0xff]  ;;  %v2455_v48 = vld [vmem:[#allocation4 + $0x188] sm:$0xff] }
 0x185   :  { %v587_v61 = vadd.f32 1.0, %v1624_v49  ;;  %v2458_v49 = vld [vmem:[#allocation4 + $0x190] sm:$0xff] }
 0x186   :  { %1627 = vrcp.f32 %v568_v53  ;;  %v580_v57 = vand.u32 2147483648, %v568_v53  ;;  %v578_v54 = vand.u32 2147483647, %v568_v53  ;;  %vm574_vm0 = vweird.f32 %v568_v53 }
 0x187   :  { %1629 = vrcp.f32 %v587_v61  ;;  %v599_v32 = vand.u32 2147483648, %v587_v61  ;;  %v597_v3 = vand.u32 2147483647, %v587_v61  ;;  %vm593_vm1 = vweird.f32 %v587_v61 }
 0x188   :  { %v581_v0 = vor.u32 1.1754944e-38, %v580_v57  ;;  %vm579_vm4 = vcmp.eq.f32.partialorder %v578_v54, 8.507059e+37  ;;  %v2500_v57 = vld [vmem:[#allocation4 + $0x100] sm:$0xff]  ;;  %v2509_v54 = vld [vmem:[#allocation4 + $0x118] sm:$0xff] }
 0x189   :  { %v600_v8 = vor.u32 1.1754944e-38, %v599_v32  ;;  %vm598_vm5 = vcmp.eq.f32.partialorder %v597_v3, 8.507059e+37  ;;  %v2503_v32 = vld [vmem:[#allocation4 + $0x108] sm:$0xff] }
 0x18a   :  { %v1626_v4 = vpop.eup %1625  ;;  %v2515_v3 = vld [vmem:[#allocation4 + $0xe8] sm:$0xff] }
 0x18b   :  { %v607_v19 = vadd.f32 1.0, %v1626_v4  ;;  %v2470_v4 = vld [vmem:[#allocation4 + $0x170] sm:$0xff] }
 0x18c   :  { %v1628_v63 = vpop.eup %1627 }
 0x18d   :  { %v1630_v6 = vpop.eup %1629  ;;  %v570_v55 = vmul.f32 %v1628_v63, %v568_v53  ;;  %1631 = vrcp.f32 %v607_v19  ;;  %vm575_vm14 = vweird.f32 %v1628_v63  ;;  %v619_v21 = vand.u32 2147483648, %v607_v19  ;;  %v2461_v53 = vld [vmem:[#allocation4 + $0x198] sm:$0xff] }
 0x18e   :  { %v589_v50 = vmul.f32 %v1630_v6, %v587_v61  ;;  %1633 = vtanh.f32 %v563_v56  ;;  %vm594_vm15 = vweird.f32 %v1630_v6  ;;  %vm576_vm2 = vmor %vm574_vm0, %vm575_vm14  ;;  %vm613_vm7 = vweird.f32 %v607_v19  ;;  %v2464_v61 = vld [vmem:[#allocation4 + $0x160] sm:$0xff]  ;;  %v2482_v56 = vld [vmem:[#allocation4 + $0x150] sm:$0xff] }
 0x18f   :  { %v571_v51 = vsub.f32 1.0, %v570_v55  ;;  %vm595_vm3 = vmor %vm593_vm1, %vm594_vm15  ;;  %v617_v22 = vand.u32 2147483647, %v607_v19  ;;  %v620_v24 = vor.u32 1.1754944e-38, %v619_v21  ;;  %v2488_v55 = vld [vmem:[#allocation4 + $0x120] sm:$0xff]  ;;  %v2566_v21 = vld [vmem:[#allocation4 + $0x70] sm:$0xff] }
 0x190   :  { %v590_v5 = vsub.f32 1.0, %v589_v50  ;;  %v2491_v50 = vld [vmem:[#allocation4 + $0x128] sm:$0xff]  ;;  %3038 = vst [vmem:[#allocation23_spill] sm:$0xff] %v2566_v21 }
 0x191   :  { %v572_v59 = vmul.f32 %v1628_v63, %v571_v51  ;;  %vm618_vm9 = vcmp.eq.f32.partialorder %v617_v22, 8.507059e+37  ;;  %v2494_v51 = vld [vmem:[#allocation4 + $0x130] sm:$0xff]  ;;  %v2569_v22 = vld [vmem:[#allocation4 + $0x78] sm:$0xff] }
 0x192   :  { %v591_v62 = vmul.f32 %v1630_v6, %v590_v5  ;;  %v2497_v5 = vld [vmem:[#allocation4 + $0x138] sm:$0xff]  ;;  %3039 = vst [vmem:[#allocation22_spill] sm:$0xff] %v2569_v22 }
 0x193   :  { %v1632_v60 = vpop.eup %1631  ;;  %v573_v1 = vadd.f32 %v1628_v63, %v572_v59  ;;  %v2506_v59 = vld [vmem:[#allocation4 + $0x110] sm:$0xff] }
 0x194   :  { %v592_v2 = vadd.f32 %v1630_v6, %v591_v62  ;;  %v609_v7 = vmul.f32 %v1632_v60, %v607_v19  ;;  %v1634_v10 = vpop.eup %1633  ;;  %vm614_vm6 = vweird.f32 %v1632_v60  ;;  %v2473_v19 = vld [vmem:[#allocation4 + $0x178] sm:$0xff]  ;;  %v2512_v62 = vld [vmem:[#allocation4 + $0xe0] sm:$0xff] }
 0x195   :  { %v577_v9 = vsel %vm576_vm2, %v1628_v63, %v573_v1  ;;  %vm615_vm8 = vmor %vm613_vm7, %vm614_vm6  ;;  %v2476_v63 = vld [vmem:[#allocation4 + $0x140] sm:$0xff]  ;;  %v2521_v1 = vld [vmem:[#allocation4 + $0xf8] sm:$0xff] }
 0x196   :  { %v582_v11 = vsel %vm579_vm4, %v581_v0, %v577_v9  ;;  %v596_v12 = vsel %vm595_vm3, %v1630_v6, %v592_v2  ;;  %v610_v13 = vsub.f32 1.0, %v609_v7  ;;  %v2485_v6 = vld [vmem:[#allocation4 + $0x158] sm:$0xff]  ;;  %v2524_v0 = vld [vmem:[#allocation4 + $0xc0] sm:$0xff]  ;;  %v2527_v2 = vld [vmem:[#allocation4 + $0xc8] sm:$0xff] }
 0x197   :  { %v601_v14 = vsel %vm598_vm5, %v600_v8, %v596_v12  ;;  %v624_v15 = vmul.f32 %v1634_v10, %v582_v11  ;;  %v2530_v7 = vld [vmem:[#allocation4 + $0xd0] sm:$0xff]  ;;  %v2533_v8 = vld [vmem:[#allocation4 + $0xd8] sm:$0xff]  ;;  %v2536_v9 = vld [vmem:[#allocation4 + $0xa0] sm:$0xff] }
 0x198   :  { %v623_v16 = vmul.f32 %v601_v14, %v2341_v45  ;;  %v611_v17 = vmul.f32 %v1632_v60, %v610_v13  ;;  %v2416_v45 = vld [vmem:[#allocation4 + $0x1e0] sm:$0xff]  ;;  %3026 = vst [vmem:[#allocation11_spill] sm:$0xff] %v2530_v7  ;;  %v2539_v10 = vld [vmem:[#allocation4 + $0xa8] sm:$0xff]  ;;  %v2542_v11 = vld [vmem:[#allocation4 + $0xb0] sm:$0xff] }
 0x199   :  { %3027 = vst [vmem:[#allocation10_spill] sm:$0xff] %v2533_v8  ;;  %v2545_v12 = vld [vmem:[#allocation4 + $0xb8] sm:$0xff]  ;;  %v2548_v13 = vld [vmem:[#allocation4 + $0x80] sm:$0xff]  ;;  %v2551_v14 = vld [vmem:[#allocation4 + $0x88] sm:$0xff] }
 0x19a   :  { %v2413_v18 = vadd.f32 %v624_v15, %v623_v16  ;;  %v612_v20 = vadd.f32 %v1632_v60, %v611_v17  ;;  %3028 = vst [vmem:[#allocation12_spill] sm:$0xff] %v2536_v9  ;;  %v2554_v15 = vld [vmem:[#allocation4 + $0x90] sm:$0xff]  ;;  %v2557_v16 = vld [vmem:[#allocation4 + $0x98] sm:$0xff]  ;;  %v2560_v17 = vld [vmem:[#allocation4 + $0x60] sm:$0xff] }
 0x19b   :  { %3029 = vst [vmem:[#allocation13_spill] sm:$0xff] %v2539_v10 }
 0x19c   :  { %1635 = vtanh.f32 %v2413_v18  ;;  %v616_v23 = vsel %vm615_vm8, %v1632_v60, %v612_v20  ;;  %v2518_v60 = vld [vmem:[#allocation4 + $0xf0] sm:$0xff]  ;;  %3030 = vst [vmem:[#allocation15_spill] sm:$0xff] %v2542_v11  ;;  %v2563_v20 = vld [vmem:[#allocation4 + $0x68] sm:$0xff] }
 0x19d   :  { %v621_v26 = vsel %vm618_vm9, %v620_v24, %v616_v23  ;;  %3031 = vst [vmem:[#allocation14_spill] sm:$0xff] %v2545_v12  ;;  %v2572_v23 = vld [vmem:[#allocation4 + $0x40] sm:$0xff]  ;;  %v2575_v24 = vld [vmem:[#allocation4 + $0x48] sm:$0xff] }
 0x19e   :  { %3032 = vst [vmem:[#allocation16_spill] sm:$0xff] %v2548_v13 }
 0x19f   :  { %3033 = vst [vmem:[#allocation17_spill] sm:$0xff] %v2551_v14 }
 0x1a0   :  { %3034 = vst [vmem:[#allocation19_spill] sm:$0xff] %v2554_v15 }
 0x1a1   :  { %3035 = vst [vmem:[#allocation18_spill] sm:$0xff] %v2557_v16 }
 0x1a2   :  { %v1636_v25 = vpop.eup %1635  ;;  %3036 = vst [vmem:[#allocation20_spill] sm:$0xff] %v2560_v17 }
 0x1a3   :  { %v627_v27 = vmul.f32 %v1636_v25, %v621_v26  ;;  %3037 = vst [vmem:[#allocation21_spill] sm:$0xff] %v2563_v20  ;;  %v2578_v25 = vld [vmem:[#allocation4 + $0x50] sm:$0xff]  ;;  %v2581_v26 = vld [vmem:[#allocation4 + $0x58] sm:$0xff] }
 0x1a4   :  { %3040 = vst [vmem:[#allocation24_spill] sm:$0xff] %v2572_v23 }
 0x1a5   :  { %628 = vst [vmem:[#allocation7 + $0x8] sm:$0xff] %v627_v27  ;;  %645 = vmatmul.f32.vlgmr.msrb.gmra.mxu0 %v627_v27  ;;  %665 = vmatmul.f32.vlgmr.msrb.gmra.mxu1 %v627_v27 }
 0x1a6   :  { %685 = vmatmul.f32.vlgmr.msrb.gmra.mxu2 %v627_v27  ;;  %705 = vmatmul.f32.vlgmr.msrb.gmra.mxu3 %v627_v27  ;;  %3041 = vst [vmem:[#allocation25_spill] sm:$0xff] %v2575_v24  ;;  %v2584_v27 = vld [vmem:[#allocation4 + $0x20] sm:$0xff] }
 0x1a7   :  { %925 = vmatpush.msrb.mxu0 %v2416_v45  ;;  %945 = vmatpush.msrb.mxu1 %v2419_v35  ;;  %3042 = vst [vmem:[#allocation27_spill] sm:$0xff] %v2578_v25 }
 0x1a8   :  { %965 = vmatpush.msrb.mxu2 %v2422_v36  ;;  %985 = vmatpush.msrb.mxu3 %v2425_v37  ;;  %3043 = vst [vmem:[#allocation26_spill] sm:$0xff] %v2581_v26 }
 0x1a9   :  { %926 = vmatpush.msrb.mxu0 %v2428_v38  ;;  %946 = vmatpush.msrb.mxu1 %v2431_v39  ;;  %3044 = vst [vmem:[#allocation28_spill] sm:$0xff] %v2584_v27 }
 0x1aa   :  { %966 = vmatpush.msrb.mxu2 %v2434_v40  ;;  %986 = vmatpush.msrb.mxu3 %v2437_v41 }
 0x1ab   :  { %927 = vmatpush.msrb.mxu0 %v2440_v42  ;;  %947 = vmatpush.msrb.mxu1 %v2443_v43 }
 0x1ac   :  { %967 = vmatpush.msrb.mxu2 %v2446_v44  ;;  %987 = vmatpush.msrb.mxu3 %v2449_v46 }
 0x1ad   :  { %928 = vmatpush.msrb.mxu0 %v2452_v47  ;;  %948 = vmatpush.msrb.mxu1 %v2455_v48 }
 0x1ae   :  { %968 = vmatpush.msrb.mxu2 %v2458_v49  ;;  %988 = vmatpush.msrb.mxu3 %v2461_v53 }
 0x1af   :  { %929 = vmatpush.msrb.mxu0 %v2464_v61  ;;  %949 = vmatpush.msrb.mxu1 %v2467_v52 }
 0x1b0   :  { %969 = vmatpush.msrb.mxu2 %v2470_v4  ;;  %989 = vmatpush.msrb.mxu3 %v2473_v19 }
 0x1b1   :  { %930 = vmatpush.msrb.mxu0 %v2476_v63  ;;  %950 = vmatpush.msrb.mxu1 %v2479_v58 }
 0x1b2   :  { %970 = vmatpush.msrb.mxu2 %v2482_v56  ;;  %990 = vmatpush.msrb.mxu3 %v2485_v6 }
 0x1b3   :  { %931 = vmatpush.msrb.mxu0 %v2488_v55  ;;  %951 = vmatpush.msrb.mxu1 %v2491_v50 }
 0x1b4   :  { %971 = vmatpush.msrb.mxu2 %v2494_v51  ;;  %991 = vmatpush.msrb.mxu3 %v2497_v5 }
 0x1b5   :  { %932 = vmatpush.msrb.mxu0 %v2500_v57  ;;  %952 = vmatpush.msrb.mxu1 %v2503_v32 }
 0x1b6   :  { %972 = vmatpush.msrb.mxu2 %v2506_v59  ;;  %992 = vmatpush.msrb.mxu3 %v2509_v54 }
 0x1b7   :  { %933 = vmatpush.msrb.mxu0 %v2512_v62  ;;  %953 = vmatpush.msrb.mxu1 %v2515_v3 }
 0x1b8   :  { %973 = vmatpush.msrb.mxu2 %v2518_v60  ;;  %993 = vmatpush.msrb.mxu3 %v2521_v1 }
 0x1b9   :  { %934 = vmatpush.msrb.mxu0 %v2524_v0  ;;  %954 = vmatpush.msrb.mxu1 %v2527_v2 }
 0x1ba   :  { %974 = vmatpush.msrb.mxu2 %v2530_v7  ;;  %994 = vmatpush.msrb.mxu3 %v2533_v8 }
 0x1bb   :  { %935 = vmatpush.msrb.mxu0 %v2536_v9  ;;  %955 = vmatpush.msrb.mxu1 %v2539_v10 }
 0x1bc   :  { %975 = vmatpush.msrb.mxu2 %v2542_v11  ;;  %995 = vmatpush.msrb.mxu3 %v2545_v12 }
 0x1bd   :  { %936 = vmatpush.msrb.mxu0 %v2548_v13  ;;  %956 = vmatpush.msrb.mxu1 %v2551_v14 }
 0x1be   :  { %976 = vmatpush.msrb.mxu2 %v2554_v15  ;;  %996 = vmatpush.msrb.mxu3 %v2557_v16 }
 0x1bf   :  { %937 = vmatpush.msrb.mxu0 %v2560_v17  ;;  %957 = vmatpush.msrb.mxu1 %v2563_v20 }
 0x1c0   :  { %977 = vmatpush.msrb.mxu2 %v2566_v21  ;;  %997 = vmatpush.msrb.mxu3 %v2569_v22  ;;  %v2587_v22 = vld [vmem:[#allocation4 + $0x28] sm:$0xff] }
 0x1c1   :  { %938 = vmatpush.msrb.mxu0 %v2572_v23  ;;  %958 = vmatpush.msrb.mxu1 %v2575_v24  ;;  %3045 = vst [vmem:[#allocation29_spill] sm:$0xff] %v2587_v22  ;;  %v3046_v24 = vld [vmem:[#allocation40_spill] sm:$0xff]  ;;  %v3047_v23 = vld [vmem:[#allocation41_spill] sm:$0xff] }
 0x1c2   :  { %978 = vmatpush.msrb.mxu2 %v2578_v25  ;;  %998 = vmatpush.msrb.mxu3 %v2581_v26 }
 0x1c3   :  { %939 = vmatpush.msrb.mxu0 %v2584_v27  ;;  %959 = vmatpush.msrb.mxu1 %v2587_v22 }
 0x1c4   :  { %979 = vmatpush.msrb.mxu2 %v3016_v28  ;;  %999 = vmatpush.msrb.mxu3 %v3017_v29  ;;  %v3048_v29 = vld [vmem:[#allocation43_spill] sm:$0xff] }
 0x1c5   :  { %940 = vmatpush.msrb.mxu0 %v3018_v30  ;;  %960 = vmatpush.msrb.mxu1 %v3019_v31 }
 0x1c6   :  { %980 = vmatpush.msrb.mxu2 %v3020_v33  ;;  %1000 = vmatpush.msrb.mxu3 %v3021_v34 }
 0x222   :  { %v646_v26 = vpop.f32.mrf.mxu0  ;;  %v666_v25 = vpop.f32.mrf.mxu1 }
 0x223   :  { %v709_v27 = vadd.f32 %v646_v26, %v3046_v24  ;;  %v710_v21 = vadd.f32 %v666_v25, %v3047_v23  ;;  %v3049_v23 = vld [vmem:[#allocation42_spill] sm:$0xff] }
 0x225   :  { %v1580_v20 = vmul.f32 -1.442695, %v709_v27  ;;  %v1581_v22 = vmul.f32 -1.442695, %v710_v21 }
 0x227   :  { %1637 = vpow2.f32 %v1580_v20 }
 0x228   :  { %1639 = vpow2.f32 %v1581_v22 }
 0x229   :  { %v706_v28 = vpop.f32.mrf.mxu3  ;;  %v686_v34 = vpop.f32.mrf.mxu2 }
 0x22a   :  { %v712_v17 = vadd.f32 %v706_v28, %v3048_v29  ;;  %v711_v25 = vadd.f32 %v686_v34, %v3049_v23 }
 0x22c   :  { %v1582_v30 = vmul.f32 -1.442695, %v712_v17 }
 0x22d   :  { %v1638_v16 = vpop.eup %1637 }
 0x22e   :  { %v1640_v31 = vpop.eup %1639  ;;  %v716_v15 = vadd.f32 1.0, %v1638_v16  ;;  %1641 = vpow2.f32 %v1582_v30 }
 0x22f   :  { %v735_v33 = vadd.f32 1.0, %v1640_v31 }
 0x230   :  { %1643 = vrcp.f32 %v716_v15  ;;  %v728_v17 = vand.u32 2147483648, %v716_v15  ;;  %v726_v30 = vand.u32 2147483647, %v716_v15  ;;  %vm722_vm12 = vweird.f32 %v716_v15 }
 0x231   :  { %1645 = vrcp.f32 %v735_v33  ;;  %v747_v29 = vand.u32 2147483648, %v735_v33  ;;  %v745_v13 = vand.u32 2147483647, %v735_v33  ;;  %vm741_vm13 = vweird.f32 %v735_v33 }
 0x232   :  { %v729_v34 = vor.u32 1.1754944e-38, %v728_v17  ;;  %vm727_vm0 = vcmp.eq.f32.partialorder %v726_v30, 8.507059e+37 }
 0x233   :  { %vm746_vm1 = vcmp.eq.f32.partialorder %v745_v13, 8.507059e+37 }
 0x234   :  { %v1642_v14 = vpop.eup %1641 }
 0x235   :  { %v755_v24 = vadd.f32 1.0, %v1642_v14 }
 0x236   :  { %v1644_v26 = vpop.eup %1643 }
 0x237   :  { %v1646_v21 = vpop.eup %1645  ;;  %v718_v20 = vmul.f32 %v1644_v26, %v716_v15  ;;  %1647 = vrcp.f32 %v755_v24  ;;  %vm723_vm10 = vweird.f32 %v1644_v26  ;;  %v767_v17 = vand.u32 2147483648, %v755_v24 }
 0x238   :  { %v737_v22 = vmul.f32 %v1646_v21, %v735_v33  ;;  %1649 = vtanh.f32 %v711_v25  ;;  %vm742_vm11 = vweird.f32 %v1646_v21  ;;  %vm724_vm14 = vmor %vm722_vm12, %vm723_vm10  ;;  %vm761_vm3 = vweird.f32 %v755_v24 }
 0x239   :  { %v719_v27 = vsub.f32 1.0, %v718_v20  ;;  %vm743_vm15 = vmor %vm741_vm13, %vm742_vm11  ;;  %v748_v20 = vor.u32 1.1754944e-38, %v747_v29  ;;  %v768_v30 = vor.u32 1.1754944e-38, %v767_v17  ;;  %v3068_v17 = vld [vmem:[#allocation28_spill] sm:$0xff] }
 0x23a   :  { %v738_v28 = vsub.f32 1.0, %v737_v22 }
 0x23b   :  { %v720_v16 = vmul.f32 %v1644_v26, %v719_v27 }
 0x23c   :  { %v739_v31 = vmul.f32 %v1646_v21, %v738_v28 }
 0x23d   :  { %v1648_v12 = vpop.eup %1647  ;;  %v721_v14 = vadd.f32 %v1644_v26, %v720_v16 }
 0x23e   :  { %v740_v23 = vadd.f32 %v1646_v21, %v739_v31  ;;  %v757_v11 = vmul.f32 %v1648_v12, %v755_v24  ;;  %v1650_v25 = vpop.eup %1649  ;;  %vm762_vm2 = vweird.f32 %v1648_v12  ;;  %v3057_v31 = vld [vmem:[#allocation17_spill] sm:$0xff] }
 0x23f   :  { %v725_v22 = vsel %vm724_vm14, %v1644_v26, %v721_v14  ;;  %v765_v26 = vand.u32 2147483647, %v755_v24  ;;  %vm763_vm4 = vmor %vm761_vm3, %vm762_vm2  ;;  %v3056_v24 = vld [vmem:[#allocation16_spill] sm:$0xff]  ;;  %v3058_v14 = vld [vmem:[#allocation19_spill] sm:$0xff] }
 0x240   :  { %v730_v10 = vsel %vm727_vm0, %v729_v34, %v725_v22  ;;  %v744_v27 = vsel %vm743_vm15, %v1646_v21, %v740_v23  ;;  %v758_v9 = vsub.f32 1.0, %v757_v11  ;;  %v3059_v34 = vld [vmem:[#allocation18_spill] sm:$0xff]  ;;  %v3060_v23 = vld [vmem:[#allocation20_spill] sm:$0xff]  ;;  %v3062_v22 = vld [vmem:[#allocation23_spill] sm:$0xff] }
 0x241   :  { %v749_v28 = vsel %vm746_vm1, %v748_v20, %v744_v27  ;;  %v772_v8 = vmul.f32 %v1650_v25, %v730_v10  ;;  %vm766_vm5 = vcmp.eq.f32.partialorder %v765_v26, 8.507059e+37  ;;  %v3054_v10 = vld [vmem:[#allocation15_spill] sm:$0xff]  ;;  %v3061_v20 = vld [vmem:[#allocation21_spill] sm:$0xff]  ;;  %v3063_v25 = vld [vmem:[#allocation22_spill] sm:$0xff] }
 0x242   :  { %v771_v7 = vmul.f32 %v749_v28, %v2413_v18  ;;  %v759_v16 = vmul.f32 %v1648_v12, %v758_v9  ;;  %v3050_v18 = vld [vmem:[#allocation11_spill] sm:$0xff]  ;;  %v3053_v9 = vld [vmem:[#allocation13_spill] sm:$0xff]  ;;  %v3064_v27 = vld [vmem:[#allocation24_spill] sm:$0xff] }
 0x243   :  { %v3065_v28 = vld [vmem:[#allocation25_spill] sm:$0xff] }
 0x244   :  { %v2601_v15 = vadd.f32 %v772_v8, %v771_v7  ;;  %v760_v33 = vadd.f32 %v1648_v12, %v759_v16  ;;  %v3051_v7 = vld [vmem:[#allocation10_spill] sm:$0xff]  ;;  %v3052_v8 = vld [vmem:[#allocation12_spill] sm:$0xff]  ;;  %v3066_v16 = vld [vmem:[#allocation27_spill] sm:$0xff] }
 0x245   :  { %v3069_v26 = vld [vmem:[#allocation29_spill] sm:$0xff] }
 0x246   :  { %1651 = vtanh.f32 %v2601_v15  ;;  %v764_v29 = vsel %vm763_vm4, %v1648_v12, %v760_v33  ;;  %v3055_v12 = vld [vmem:[#allocation14_spill] sm:$0xff] }
 0x247   :  { %v769_v11 = vsel %vm766_vm5, %v768_v30, %v764_v29  ;;  %v3067_v33 = vld [vmem:[#allocation26_spill] sm:$0xff]  ;;  %v2662_v29 = vld [vmem:[#allocation4 + $0x30] sm:$0xff]  ;;  %v2665_v30 = vld [vmem:[#allocation4 + $0x38] sm:$0xff] }
 0x248   :  { %3070 = vst [vmem:[#allocation30_spill] sm:$0xff] %v2662_v29 }
 0x249   :  { %3071 = vst [vmem:[#allocation31_spill] sm:$0xff] %v2665_v30 }
 0x24c   :  { %v1652_v13 = vpop.eup %1651 }
 0x24d   :  { %v775_v21 = vmul.f32 %v1652_v13, %v769_v11  ;;  %v2668_v13 = vld [vmem:[#allocation4] sm:$0xff]  ;;  %v2671_v11 = vld [vmem:[#allocation4 + $0x8] sm:$0xff] }
 0x24e   :  { %3072 = vst [vmem:[#allocation32_spill] sm:$0xff] %v2668_v13 }
 0x24f   :  { %776 = vst [vmem:[#allocation7 + $0x10] sm:$0xff] %v775_v21  ;;  %793 = vmatmul.f32.vlgmr.msra.gmra.mxu0 %v775_v21  ;;  %813 = vmatmul.f32.vlgmr.msra.gmra.mxu1 %v775_v21 }
 0x250   :  { %833 = vmatmul.f32.vlgmr.msra.gmra.mxu2 %v775_v21  ;;  %853 = vmatmul.f32.vlgmr.msra.gmra.mxu3 %v775_v21  ;;  %3073 = vst [vmem:[#allocation33_spill] sm:$0xff] %v2671_v11  ;;  %v2674_v21 = vld [vmem:[#allocation4 + $0x10] sm:$0xff] }
 0x251   :  { %1073 = vmatpush.msra.mxu0 %v2416_v45  ;;  %1093 = vmatpush.msra.mxu1 %v2419_v35  ;;  %3074 = vst [vmem:[#allocation34_spill] sm:$0xff] %v2674_v21 }
 0x252   :  { %1113 = vmatpush.msra.mxu2 %v2422_v36  ;;  %1133 = vmatpush.msra.mxu3 %v2425_v37 }
 0x253   :  { %1074 = vmatpush.msra.mxu0 %v2428_v38  ;;  %1094 = vmatpush.msra.mxu1 %v2431_v39 }
 0x254   :  { %1114 = vmatpush.msra.mxu2 %v2434_v40  ;;  %1134 = vmatpush.msra.mxu3 %v2437_v41 }
 0x255   :  { %1075 = vmatpush.msra.mxu0 %v2440_v42  ;;  %1095 = vmatpush.msra.mxu1 %v2443_v43 }
 0x256   :  { %1115 = vmatpush.msra.mxu2 %v2446_v44  ;;  %1135 = vmatpush.msra.mxu3 %v2449_v46 }
 0x257   :  { %1076 = vmatpush.msra.mxu0 %v2452_v47  ;;  %1096 = vmatpush.msra.mxu1 %v2455_v48 }
 0x258   :  { %1116 = vmatpush.msra.mxu2 %v2458_v49  ;;  %1136 = vmatpush.msra.mxu3 %v2461_v53 }
 0x259   :  { %1077 = vmatpush.msra.mxu0 %v2464_v61  ;;  %1097 = vmatpush.msra.mxu1 %v2467_v52 }
 0x25a   :  { %1117 = vmatpush.msra.mxu2 %v2470_v4  ;;  %1137 = vmatpush.msra.mxu3 %v2473_v19 }
 0x25b   :  { %1078 = vmatpush.msra.mxu0 %v2476_v63  ;;  %1098 = vmatpush.msra.mxu1 %v2479_v58 }
 0x25c   :  { %1118 = vmatpush.msra.mxu2 %v2482_v56  ;;  %1138 = vmatpush.msra.mxu3 %v2485_v6 }
 0x25d   :  { %1079 = vmatpush.msra.mxu0 %v2488_v55  ;;  %1099 = vmatpush.msra.mxu1 %v2491_v50 }
 0x25e   :  { %1119 = vmatpush.msra.mxu2 %v2494_v51  ;;  %1139 = vmatpush.msra.mxu3 %v2497_v5 }
 0x25f   :  { %1080 = vmatpush.msra.mxu0 %v2500_v57  ;;  %1100 = vmatpush.msra.mxu1 %v2503_v32 }
 0x260   :  { %1120 = vmatpush.msra.mxu2 %v2506_v59  ;;  %1140 = vmatpush.msra.mxu3 %v2509_v54 }
 0x261   :  { %1081 = vmatpush.msra.mxu0 %v2512_v62  ;;  %1101 = vmatpush.msra.mxu1 %v2515_v3 }
 0x262   :  { %1121 = vmatpush.msra.mxu2 %v2518_v60  ;;  %1141 = vmatpush.msra.mxu3 %v2521_v1 }
 0x263   :  { %1082 = vmatpush.msra.mxu0 %v2524_v0  ;;  %1102 = vmatpush.msra.mxu1 %v2527_v2 }
 0x264   :  { %1122 = vmatpush.msra.mxu2 %v3050_v18  ;;  %1142 = vmatpush.msra.mxu3 %v3051_v7 }
 0x265   :  { %1083 = vmatpush.msra.mxu0 %v3052_v8  ;;  %1103 = vmatpush.msra.mxu1 %v3053_v9 }
 0x266   :  { %1123 = vmatpush.msra.mxu2 %v3054_v10  ;;  %1143 = vmatpush.msra.mxu3 %v3055_v12 }
 0x267   :  { %1084 = vmatpush.msra.mxu0 %v3056_v24  ;;  %1104 = vmatpush.msra.mxu1 %v3057_v31 }
 0x268   :  { %1124 = vmatpush.msra.mxu2 %v3058_v14  ;;  %1144 = vmatpush.msra.mxu3 %v3059_v34 }
 0x269   :  { %1085 = vmatpush.msra.mxu0 %v3060_v23  ;;  %1105 = vmatpush.msra.mxu1 %v3061_v20 }
 0x26a   :  { %1125 = vmatpush.msra.mxu2 %v3062_v22  ;;  %1145 = vmatpush.msra.mxu3 %v3063_v25 }
 0x26b   :  { %1086 = vmatpush.msra.mxu0 %v3064_v27  ;;  %1106 = vmatpush.msra.mxu1 %v3065_v28 }
 0x26c   :  { %1126 = vmatpush.msra.mxu2 %v3066_v16  ;;  %1146 = vmatpush.msra.mxu3 %v3067_v33  ;;  %v3076_v33 = vld [vmem:[#allocation44_spill] sm:$0xff]  ;;  %v3077_v16 = vld [vmem:[#allocation45_spill] sm:$0xff] }
 0x26d   :  { %1087 = vmatpush.msra.mxu0 %v3068_v17  ;;  %1107 = vmatpush.msra.mxu1 %v3069_v26  ;;  %v2677_v26 = vld [vmem:[#allocation4 + $0x18] sm:$0xff] }
 0x26e   :  { %1127 = vmatpush.msra.mxu2 %v2662_v29  ;;  %1147 = vmatpush.msra.mxu3 %v2665_v30  ;;  %3075 = vst [vmem:[#allocation35_spill] sm:$0xff] %v2677_v26 }
 0x26f   :  { %1088 = vmatpush.msra.mxu0 %v2668_v13  ;;  %1108 = vmatpush.msra.mxu1 %v2671_v11  ;;  %v3078_v11 = vld [vmem:[#allocation47_spill] sm:$0xff] }
 0x270   :  { %1128 = vmatpush.msra.mxu2 %v2674_v21  ;;  %1148 = vmatpush.msra.mxu3 %v2677_v26 }
 0x2cc   :  { %v794_v29 = vpop.f32.mrf.mxu0  ;;  %v814_v17 = vpop.f32.mrf.mxu1 }
 0x2cd   :  { %v857_v30 = vadd.f32 %v794_v29, %v3076_v33  ;;  %v858_v28 = vadd.f32 %v814_v17, %v3077_v16  ;;  %v3079_v16 = vld [vmem:[#allocation46_spill] sm:$0xff] }
 0x2cf   :  { %v1583_v27 = vmul.f32 -1.442695, %v857_v30  ;;  %v1584_v13 = vmul.f32 -1.442695, %v858_v28 }
 0x2d1   :  { %1653 = vpow2.f32 %v1583_v27 }
 0x2d2   :  { %1655 = vpow2.f32 %v1584_v13 }
 0x2d3   :  { %v854_v25 = vpop.f32.mrf.mxu3  ;;  %v834_v26 = vpop.f32.mrf.mxu2 }
 0x2d4   :  { %v860_v22 = vadd.f32 %v854_v25, %v3078_v11  ;;  %v859_v17 = vadd.f32 %v834_v26, %v3079_v16 }
 0x2d6   :  { %v1585_v20 = vmul.f32 -1.442695, %v860_v22 }
 0x2d7   :  { %v1654_v23 = vpop.eup %1653 }
 0x2d8   :  { %v1656_v21 = vpop.eup %1655  ;;  %v864_v34 = vadd.f32 1.0, %v1654_v23  ;;  %1657 = vpow2.f32 %v1585_v20 }
 0x2d9   :  { %v883_v14 = vadd.f32 1.0, %v1656_v21 }
 0x2da   :  { %1659 = vrcp.f32 %v864_v34  ;;  %v876_v22 = vand.u32 2147483648, %v864_v34  ;;  %v874_v20 = vand.u32 2147483647, %v864_v34  ;;  %vm870_vm8 = vweird.f32 %v864_v34 }
 0x2db   :  { %1661 = vrcp.f32 %v883_v14  ;;  %v895_v11 = vand.u32 2147483648, %v883_v14  ;;  %v893_v24 = vand.u32 2147483647, %v883_v14  ;;  %vm889_vm9 = vweird.f32 %v883_v14 }
 0x2dc   :  { %v877_v26 = vor.u32 1.1754944e-38, %v876_v22  ;;  %vm875_vm12 = vcmp.eq.f32.partialorder %v874_v20, 8.507059e+37 }
 0x2dd   :  { %vm894_vm13 = vcmp.eq.f32.partialorder %v893_v24, 8.507059e+37 }
 0x2de   :  { %v1658_v31 = vpop.eup %1657 }
 0x2df   :  { %v903_v33 = vadd.f32 1.0, %v1658_v31 }
 0x2e0   :  { %v1660_v29 = vpop.eup %1659 }
 0x2e1   :  { %v1662_v28 = vpop.eup %1661  ;;  %v866_v27 = vmul.f32 %v1660_v29, %v864_v34  ;;  %1663 = vrcp.f32 %v903_v33  ;;  %vm871_vm6 = vweird.f32 %v1660_v29  ;;  %v915_v22 = vand.u32 2147483648, %v903_v33 }
 0x2e2   :  { %v885_v30 = vmul.f32 %v1662_v28, %v883_v14  ;;  %1665 = vtanh.f32 %v859_v17  ;;  %vm890_vm7 = vweird.f32 %v1662_v28  ;;  %vm872_vm10 = vmor %vm870_vm8, %vm871_vm6  ;;  %vm909_vm15 = vweird.f32 %v903_v33 }
 0x2e3   :  { %v867_v13 = vsub.f32 1.0, %v866_v27  ;;  %vm891_vm11 = vmor %vm889_vm9, %vm890_vm7  ;;  %v896_v27 = vor.u32 1.1754944e-38, %v895_v11  ;;  %v916_v20 = vor.u32 1.1754944e-38, %v915_v22  ;;  %v3098_v22 = vld [vmem:[#allocation28_spill] sm:$0xff] }
 0x2e4   :  { %v886_v25 = vsub.f32 1.0, %v885_v30 }
 0x2e5   :  { %v868_v23 = vmul.f32 %v1660_v29, %v867_v13 }
 0x2e6   :  { %v887_v21 = vmul.f32 %v1662_v28, %v886_v25 }
 0x2e7   :  { %v1664_v12 = vpop.eup %1663  ;;  %v869_v31 = vadd.f32 %v1660_v29, %v868_v23 }
 0x2e8   :  { %v888_v16 = vadd.f32 %v1662_v28, %v887_v21  ;;  %v905_v10 = vmul.f32 %v1664_v12, %v903_v33  ;;  %v1666_v17 = vpop.eup %1665  ;;  %vm910_vm14 = vweird.f32 %v1664_v12  ;;  %v3087_v21 = vld [vmem:[#allocation17_spill] sm:$0xff] }
 0x2e9   :  { %v873_v30 = vsel %vm872_vm10, %v1660_v29, %v869_v31  ;;  %v913_v29 = vand.u32 2147483647, %v903_v33  ;;  %vm911_vm0 = vmor %vm909_vm15, %vm910_vm14  ;;  %v3086_v33 = vld [vmem:[#allocation16_spill] sm:$0xff]  ;;  %v3088_v31 = vld [vmem:[#allocation19_spill] sm:$0xff] }
 0x2ea   :  { %v878_v9 = vsel %vm875_vm12, %v877_v26, %v873_v30  ;;  %v892_v13 = vsel %vm891_vm11, %v1662_v28, %v888_v16  ;;  %v906_v8 = vsub.f32 1.0, %v905_v10  ;;  %v3089_v26 = vld [vmem:[#allocation18_spill] sm:$0xff]  ;;  %v3090_v16 = vld [vmem:[#allocation20_spill] sm:$0xff]  ;;  %v3092_v30 = vld [vmem:[#allocation23_spill] sm:$0xff] }
 0x2eb   :  { %v897_v25 = vsel %vm894_vm13, %v896_v27, %v892_v13  ;;  %v920_v7 = vmul.f32 %v1666_v17, %v878_v9  ;;  %vm914_vm1 = vcmp.eq.f32.partialorder %v913_v29, 8.507059e+37  ;;  %v3084_v9 = vld [vmem:[#allocation15_spill] sm:$0xff]  ;;  %v3091_v27 = vld [vmem:[#allocation21_spill] sm:$0xff]  ;;  %v3093_v17 = vld [vmem:[#allocation22_spill] sm:$0xff] }
 0x2ec   :  { %v919_v18 = vmul.f32 %v897_v25, %v2601_v15  ;;  %v907_v23 = vmul.f32 %v1664_v12, %v906_v8  ;;  %v3080_v15 = vld [vmem:[#allocation11_spill] sm:$0xff]  ;;  %v3083_v8 = vld [vmem:[#allocation13_spill] sm:$0xff]  ;;  %v3094_v13 = vld [vmem:[#allocation24_spill] sm:$0xff] }
 0x2ed   :  { %v3095_v25 = vld [vmem:[#allocation25_spill] sm:$0xff] }
 0x2ee   :  { %v2685_v34 = vadd.f32 %v920_v7, %v919_v18  ;;  %v908_v14 = vadd.f32 %v1664_v12, %v907_v23  ;;  %v3081_v18 = vld [vmem:[#allocation10_spill] sm:$0xff]  ;;  %v3082_v7 = vld [vmem:[#allocation12_spill] sm:$0xff]  ;;  %v3096_v23 = vld [vmem:[#allocation27_spill] sm:$0xff] }
 0x2ef   :  { %v3099_v29 = vld [vmem:[#allocation29_spill] sm:$0xff] }
 0x2f0   :  { %1667 = vtanh.f32 %v2685_v34  ;;  %v912_v11 = vsel %vm911_vm0, %v1664_v12, %v908_v14  ;;  %v3085_v12 = vld [vmem:[#allocation14_spill] sm:$0xff] }
 0x2f1   :  { %v917_v10 = vsel %vm914_vm1, %v916_v20, %v912_v11  ;;  %v3097_v14 = vld [vmem:[#allocation26_spill] sm:$0xff]  ;;  %v3101_v20 = vld [vmem:[#allocation31_spill] sm:$0xff] }
 0x2f2   :  { %v3100_v11 = vld [vmem:[#allocation30_spill] sm:$0xff] }
 0x2f6   :  { %v1668_v24 = vpop.eup %1667 }
 0x2f7   :  { %v923_v28 = vmul.f32 %v1668_v24, %v917_v10  ;;  %v3102_v24 = vld [vmem:[#allocation32_spill] sm:$0xff]  ;;  %v3103_v10 = vld [vmem:[#allocation33_spill] sm:$0xff] }
 0x2f9   :  { %924 = vst [vmem:[#allocation7 + $0x18] sm:$0xff] %v923_v28  ;;  %941 = vmatmul.f32.vlgmr.msrb.gmra.mxu0 %v923_v28  ;;  %961 = vmatmul.f32.vlgmr.msrb.gmra.mxu1 %v923_v28 }
 0x2fa   :  { %981 = vmatmul.f32.vlgmr.msrb.gmra.mxu2 %v923_v28  ;;  %1001 = vmatmul.f32.vlgmr.msrb.gmra.mxu3 %v923_v28  ;;  %v3104_v28 = vld [vmem:[#allocation34_spill] sm:$0xff] }
 0x2fb   :  { %1221 = vmatpush.msrb.mxu0 %v2416_v45  ;;  %1241 = vmatpush.msrb.mxu1 %v2419_v35 }
 0x2fc   :  { %1261 = vmatpush.msrb.mxu2 %v2422_v36  ;;  %1281 = vmatpush.msrb.mxu3 %v2425_v37 }
 0x2fd   :  { %1222 = vmatpush.msrb.mxu0 %v2428_v38  ;;  %1242 = vmatpush.msrb.mxu1 %v2431_v39 }
 0x2fe   :  { %1262 = vmatpush.msrb.mxu2 %v2434_v40  ;;  %1282 = vmatpush.msrb.mxu3 %v2437_v41 }
 0x2ff   :  { %1223 = vmatpush.msrb.mxu0 %v2440_v42  ;;  %1243 = vmatpush.msrb.mxu1 %v2443_v43 }
 0x300   :  { %1263 = vmatpush.msrb.mxu2 %v2446_v44  ;;  %1283 = vmatpush.msrb.mxu3 %v2449_v46 }
 0x301   :  { %1224 = vmatpush.msrb.mxu0 %v2452_v47  ;;  %1244 = vmatpush.msrb.mxu1 %v2455_v48 }
 0x302   :  { %1264 = vmatpush.msrb.mxu2 %v2458_v49  ;;  %1284 = vmatpush.msrb.mxu3 %v2461_v53 }
 0x303   :  { %1225 = vmatpush.msrb.mxu0 %v2464_v61  ;;  %1245 = vmatpush.msrb.mxu1 %v2467_v52 }
 0x304   :  { %1265 = vmatpush.msrb.mxu2 %v2470_v4  ;;  %1285 = vmatpush.msrb.mxu3 %v2473_v19 }
 0x305   :  { %1226 = vmatpush.msrb.mxu0 %v2476_v63  ;;  %1246 = vmatpush.msrb.mxu1 %v2479_v58 }
 0x306   :  { %1266 = vmatpush.msrb.mxu2 %v2482_v56  ;;  %1286 = vmatpush.msrb.mxu3 %v2485_v6 }
 0x307   :  { %1227 = vmatpush.msrb.mxu0 %v2488_v55  ;;  %1247 = vmatpush.msrb.mxu1 %v2491_v50 }
 0x308   :  { %1267 = vmatpush.msrb.mxu2 %v2494_v51  ;;  %1287 = vmatpush.msrb.mxu3 %v2497_v5 }
 0x309   :  { %1228 = vmatpush.msrb.mxu0 %v2500_v57  ;;  %1248 = vmatpush.msrb.mxu1 %v2503_v32 }
 0x30a   :  { %1268 = vmatpush.msrb.mxu2 %v2506_v59  ;;  %1288 = vmatpush.msrb.mxu3 %v2509_v54 }
 0x30b   :  { %1229 = vmatpush.msrb.mxu0 %v2512_v62  ;;  %1249 = vmatpush.msrb.mxu1 %v2515_v3 }
 0x30c   :  { %1269 = vmatpush.msrb.mxu2 %v2518_v60  ;;  %1289 = vmatpush.msrb.mxu3 %v2521_v1 }
 0x30d   :  { %1230 = vmatpush.msrb.mxu0 %v2524_v0  ;;  %1250 = vmatpush.msrb.mxu1 %v2527_v2 }
 0x30e   :  { %1270 = vmatpush.msrb.mxu2 %v3080_v15  ;;  %1290 = vmatpush.msrb.mxu3 %v3081_v18 }
 0x30f   :  { %1231 = vmatpush.msrb.mxu0 %v3082_v7  ;;  %1251 = vmatpush.msrb.mxu1 %v3083_v8 }
 0x310   :  { %1271 = vmatpush.msrb.mxu2 %v3084_v9  ;;  %1291 = vmatpush.msrb.mxu3 %v3085_v12 }
 0x311   :  { %1232 = vmatpush.msrb.mxu0 %v3086_v33  ;;  %1252 = vmatpush.msrb.mxu1 %v3087_v21 }
 0x312   :  { %1272 = vmatpush.msrb.mxu2 %v3088_v31  ;;  %1292 = vmatpush.msrb.mxu3 %v3089_v26 }
 0x313   :  { %1233 = vmatpush.msrb.mxu0 %v3090_v16  ;;  %1253 = vmatpush.msrb.mxu1 %v3091_v27 }
 0x314   :  { %1273 = vmatpush.msrb.mxu2 %v3092_v30  ;;  %1293 = vmatpush.msrb.mxu3 %v3093_v17  ;;  %v3106_v17 = vld [vmem:[#allocation48_spill] sm:$0xff]  ;;  %v3107_v30 = vld [vmem:[#allocation49_spill] sm:$0xff] }
 0x315   :  { %1234 = vmatpush.msrb.mxu0 %v3094_v13  ;;  %1254 = vmatpush.msrb.mxu1 %v3095_v25  ;;  %v3105_v13 = vld [vmem:[#allocation35_spill] sm:$0xff] }
 0x316   :  { %1274 = vmatpush.msrb.mxu2 %v3096_v23  ;;  %1294 = vmatpush.msrb.mxu3 %v3097_v14 }
 0x317   :  { %1235 = vmatpush.msrb.mxu0 %v3098_v22  ;;  %1255 = vmatpush.msrb.mxu1 %v3099_v29 }
 0x318   :  { %1275 = vmatpush.msrb.mxu2 %v3100_v11  ;;  %1295 = vmatpush.msrb.mxu3 %v3101_v20  ;;  %v3108_v20 = vld [vmem:[#allocation51_spill] sm:$0xff] }
 0x319   :  { %1236 = vmatpush.msrb.mxu0 %v3102_v24  ;;  %1256 = vmatpush.msrb.mxu1 %v3103_v10 }
 0x31a   :  { %1276 = vmatpush.msrb.mxu2 %v3104_v28  ;;  %1296 = vmatpush.msrb.mxu3 %v3105_v13 }
 0x376   :  { %v942_v25 = vpop.f32.mrf.mxu0  ;;  %v962_v23 = vpop.f32.mrf.mxu1 }
 0x377   :  { %v1005_v14 = vadd.f32 %v942_v25, %v3106_v17  ;;  %v1006_v22 = vadd.f32 %v962_v23, %v3107_v30  ;;  %v3109_v30 = vld [vmem:[#allocation50_spill] sm:$0xff] }
 0x379   :  { %v1586_v27 = vmul.f32 -1.442695, %v1005_v14  ;;  %v1587_v29 = vmul.f32 -1.442695, %v1006_v22 }
 0x37b   :  { %1669 = vpow2.f32 %v1586_v27 }
 0x37c   :  { %1671 = vpow2.f32 %v1587_v29 }
 0x37d   :  { %v1002_v11 = vpop.f32.mrf.mxu3  ;;  %v982_v13 = vpop.f32.mrf.mxu2 }
 0x37e   :  { %v1008_v16 = vadd.f32 %v1002_v11, %v3108_v20  ;;  %v1007_v23 = vadd.f32 %v982_v13, %v3109_v30 }
 0x380   :  { %v1588_v24 = vmul.f32 -1.442695, %v1008_v16 }
 0x381   :  { %v1670_v26 = vpop.eup %1669 }
 0x382   :  { %v1672_v10 = vpop.eup %1671  ;;  %v1012_v31 = vadd.f32 1.0, %v1670_v26  ;;  %1673 = vpow2.f32 %v1588_v24 }
 0x383   :  { %v1031_v28 = vadd.f32 1.0, %v1672_v10 }
 0x384   :  { %1675 = vrcp.f32 %v1012_v31  ;;  %v1024_v16 = vand.u32 2147483648, %v1012_v31  ;;  %v1022_v24 = vand.u32 2147483647, %v1012_v31  ;;  %vm1018_vm4 = vweird.f32 %v1012_v31 }
 0x385   :  { %1677 = vrcp.f32 %v1031_v28  ;;  %v1043_v20 = vand.u32 2147483648, %v1031_v28  ;;  %v1041_v33 = vand.u32 2147483647, %v1031_v28  ;;  %vm1037_vm5 = vweird.f32 %v1031_v28 }
 0x386   :  { %v1025_v13 = vor.u32 1.1754944e-38, %v1024_v16  ;;  %vm1023_vm8 = vcmp.eq.f32.partialorder %v1022_v24, 8.507059e+37 }
 0x387   :  { %vm1042_vm9 = vcmp.eq.f32.partialorder %v1041_v33, 8.507059e+37 }
 0x388   :  { %v1674_v21 = vpop.eup %1673 }
 0x389   :  { %v1051_v17 = vadd.f32 1.0, %v1674_v21 }
 0x38a   :  { %v1676_v25 = vpop.eup %1675 }
 0x38b   :  { %v1678_v14 = vpop.eup %1677  ;;  %v1014_v27 = vmul.f32 %v1676_v25, %v1012_v31  ;;  %1679 = vrcp.f32 %v1051_v17  ;;  %vm1019_vm2 = vweird.f32 %v1676_v25  ;;  %v1063_v16 = vand.u32 2147483648, %v1051_v17 }
 0x38c   :  { %v1033_v22 = vmul.f32 %v1678_v14, %v1031_v28  ;;  %1681 = vtanh.f32 %v1007_v23  ;;  %vm1038_vm3 = vweird.f32 %v1678_v14  ;;  %vm1020_vm6 = vmor %vm1018_vm4, %vm1019_vm2  ;;  %vm1057_vm11 = vweird.f32 %v1051_v17 }
 0x38d   :  { %v1015_v29 = vsub.f32 1.0, %v1014_v27  ;;  %vm1039_vm7 = vmor %vm1037_vm5, %vm1038_vm3  ;;  %v1044_v27 = vor.u32 1.1754944e-38, %v1043_v20  ;;  %v1064_v24 = vor.u32 1.1754944e-38, %v1063_v16 }
 0x38e   :  { %v1034_v11 = vsub.f32 1.0, %v1033_v22 }
 0x38f   :  { %v1016_v26 = vmul.f32 %v1676_v25, %v1015_v29 }
 0x390   :  { %v1035_v10 = vmul.f32 %v1678_v14, %v1034_v11 }
 0x391   :  { %v1680_v12 = vpop.eup %1679  ;;  %v1017_v21 = vadd.f32 %v1676_v25, %v1016_v26 }
 0x392   :  { %v1036_v30 = vadd.f32 %v1678_v14, %v1035_v10  ;;  %v1053_v9 = vmul.f32 %v1680_v12, %v1051_v17  ;;  %v1682_v23 = vpop.eup %1681  ;;  %vm1058_vm10 = vweird.f32 %v1680_v12 }
 0x393   :  { %v1021_v22 = vsel %vm1020_vm6, %v1676_v25, %v1017_v21  ;;  %v1061_v25 = vand.u32 2147483647, %v1051_v17  ;;  %vm1059_vm12 = vmor %vm1057_vm11, %vm1058_vm10  ;;  %v3139_v21 = vld [vmem:[#allocation54_spill] sm:$0xff] }
 0x394   :  { %v1026_v8 = vsel %vm1023_vm8, %v1025_v13, %v1021_v22  ;;  %v1040_v29 = vsel %vm1039_vm7, %v1678_v14, %v1036_v30  ;;  %v1054_v7 = vsub.f32 1.0, %v1053_v9 }
 0x395   :  { %v1045_v11 = vsel %vm1042_vm9, %v1044_v27, %v1040_v29  ;;  %v1068_v18 = vmul.f32 %v1682_v23, %v1026_v8  ;;  %vm1062_vm13 = vcmp.eq.f32.partialorder %v1061_v25, 8.507059e+37 }
 0x396   :  { %v1067_v15 = vmul.f32 %v1045_v11, %v2685_v34  ;;  %v1055_v26 = vmul.f32 %v1680_v12, %v1054_v7 }
 0x398   :  { %v2757_v31 = vadd.f32 %v1068_v18, %v1067_v15  ;;  %v1056_v28 = vadd.f32 %v1680_v12, %v1055_v26 }
 0x39a   :  { %1683 = vtanh.f32 %v2757_v31  ;;  %v1060_v20 = vsel %vm1059_vm12, %v1680_v12, %v1056_v28 }
 0x39b   :  { %v1065_v9 = vsel %vm1062_vm13, %v1064_v24, %v1060_v20 }
 0x3a0   :  { %v1684_v33 = vpop.eup %1683 }
 0x3a1   :  { %v1071_v14 = vmul.f32 %v1684_v33, %v1065_v9 }
 0x3a3   :  { %1072 = vst [vmem:[#allocation7 + $0x20] sm:$0xff] %v1071_v14  ;;  %1089 = vmatmul.f32.vlgmr.msra.gmra.mxu0 %v1071_v14  ;;  %1109 = vmatmul.f32.vlgmr.msra.gmra.mxu1 %v1071_v14 }
 0x3a4   :  { %1129 = vmatmul.f32.vlgmr.msra.gmra.mxu2 %v1071_v14  ;;  %1149 = vmatmul.f32.vlgmr.msra.gmra.mxu3 %v1071_v14 }
 0x3a5   :  { %1369 = vmatpush.msra.mxu0 %v2416_v45  ;;  %1389 = vmatpush.msra.mxu1 %v2419_v35  ;;  %v3110_v45 = vld [vmem:[#allocation11_spill] sm:$0xff]  ;;  %v3111_v35 = vld [vmem:[#allocation10_spill] sm:$0xff] }
 0x3a6   :  { %1409 = vmatpush.msra.mxu2 %v2422_v36  ;;  %1429 = vmatpush.msra.mxu3 %v2425_v37  ;;  %v3112_v36 = vld [vmem:[#allocation12_spill] sm:$0xff]  ;;  %v3113_v37 = vld [vmem:[#allocation13_spill] sm:$0xff] }
 0x3a7   :  { %1370 = vmatpush.msra.mxu0 %v2428_v38  ;;  %1390 = vmatpush.msra.mxu1 %v2431_v39  ;;  %v3114_v38 = vld [vmem:[#allocation15_spill] sm:$0xff]  ;;  %v3115_v39 = vld [vmem:[#allocation14_spill] sm:$0xff] }
 0x3a8   :  { %1410 = vmatpush.msra.mxu2 %v2434_v40  ;;  %1430 = vmatpush.msra.mxu3 %v2437_v41  ;;  %v3116_v40 = vld [vmem:[#allocation16_spill] sm:$0xff]  ;;  %v3117_v41 = vld [vmem:[#allocation17_spill] sm:$0xff] }
 0x3a9   :  { %1371 = vmatpush.msra.mxu0 %v2440_v42  ;;  %1391 = vmatpush.msra.mxu1 %v2443_v43  ;;  %v3118_v42 = vld [vmem:[#allocation19_spill] sm:$0xff]  ;;  %v3119_v43 = vld [vmem:[#allocation18_spill] sm:$0xff] }
 0x3aa   :  { %1411 = vmatpush.msra.mxu2 %v2446_v44  ;;  %1431 = vmatpush.msra.mxu3 %v2449_v46  ;;  %v3120_v44 = vld [vmem:[#allocation20_spill] sm:$0xff]  ;;  %v3121_v46 = vld [vmem:[#allocation21_spill] sm:$0xff] }
 0x3ab   :  { %1372 = vmatpush.msra.mxu0 %v2452_v47  ;;  %1392 = vmatpush.msra.mxu1 %v2455_v48  ;;  %v3122_v47 = vld [vmem:[#allocation23_spill] sm:$0xff]  ;;  %v3123_v48 = vld [vmem:[#allocation22_spill] sm:$0xff] }
 0x3ac   :  { %1412 = vmatpush.msra.mxu2 %v2458_v49  ;;  %1432 = vmatpush.msra.mxu3 %v2461_v53  ;;  %v3124_v49 = vld [vmem:[#allocation24_spill] sm:$0xff]  ;;  %v3125_v53 = vld [vmem:[#allocation25_spill] sm:$0xff] }
 0x3ad   :  { %1373 = vmatpush.msra.mxu0 %v2464_v61  ;;  %1393 = vmatpush.msra.mxu1 %v2467_v52  ;;  %v3126_v61 = vld [vmem:[#allocation27_spill] sm:$0xff]  ;;  %v3127_v52 = vld [vmem:[#allocation26_spill] sm:$0xff] }
 0x3ae   :  { %1413 = vmatpush.msra.mxu2 %v2470_v4  ;;  %1433 = vmatpush.msra.mxu3 %v2473_v19  ;;  %v3128_v4 = vld [vmem:[#allocation28_spill] sm:$0xff]  ;;  %v3129_v19 = vld [vmem:[#allocation29_spill] sm:$0xff] }
 0x3af   :  { %1374 = vmatpush.msra.mxu0 %v2476_v63  ;;  %1394 = vmatpush.msra.mxu1 %v2479_v58  ;;  %v3130_v63 = vld [vmem:[#allocation30_spill] sm:$0xff]  ;;  %v3131_v58 = vld [vmem:[#allocation31_spill] sm:$0xff] }
 0x3b0   :  { %1414 = vmatpush.msra.mxu2 %v2482_v56  ;;  %1434 = vmatpush.msra.mxu3 %v2485_v6  ;;  %v3132_v56 = vld [vmem:[#allocation32_spill] sm:$0xff]  ;;  %v3133_v6 = vld [vmem:[#allocation33_spill] sm:$0xff] }
 0x3b1   :  { %1375 = vmatpush.msra.mxu0 %v2488_v55  ;;  %1395 = vmatpush.msra.mxu1 %v2491_v50  ;;  %v3134_v55 = vld [vmem:[#allocation34_spill] sm:$0xff]  ;;  %v3135_v50 = vld [vmem:[#allocation35_spill] sm:$0xff] }
 0x3b2   :  { %1415 = vmatpush.msra.mxu2 %v2494_v51  ;;  %1435 = vmatpush.msra.mxu3 %v2497_v5 }
 0x3b3   :  { %1376 = vmatpush.msra.mxu0 %v2500_v57  ;;  %1396 = vmatpush.msra.mxu1 %v2503_v32  ;;  %v3136_v57 = vld [vmem:[#allocation52_spill] sm:$0xff] }
 0x3b4   :  { %1416 = vmatpush.msra.mxu2 %v2506_v59  ;;  %1436 = vmatpush.msra.mxu3 %v2509_v54  ;;  %v3137_v59 = vld [vmem:[#allocation53_spill] sm:$0xff] }
 0x3b5   :  { %1377 = vmatpush.msra.mxu0 %v2512_v62  ;;  %1397 = vmatpush.msra.mxu1 %v2515_v3 }
 0x3b6   :  { %1417 = vmatpush.msra.mxu2 %v2518_v60  ;;  %1437 = vmatpush.msra.mxu3 %v2521_v1  ;;  %v3138_v1 = vld [vmem:[#allocation55_spill] sm:$0xff] }
 0x3b7   :  { %1378 = vmatpush.msra.mxu0 %v2524_v0  ;;  %1398 = vmatpush.msra.mxu1 %v2527_v2 }
 0x3b8   :  { %1418 = vmatpush.msra.mxu2 %v3110_v45  ;;  %1438 = vmatpush.msra.mxu3 %v3111_v35 }
 0x3b9   :  { %1379 = vmatpush.msra.mxu0 %v3112_v36  ;;  %1399 = vmatpush.msra.mxu1 %v3113_v37 }
 0x3ba   :  { %1419 = vmatpush.msra.mxu2 %v3114_v38  ;;  %1439 = vmatpush.msra.mxu3 %v3115_v39 }
 0x3bb   :  { %1380 = vmatpush.msra.mxu0 %v3116_v40  ;;  %1400 = vmatpush.msra.mxu1 %v3117_v41 }
 0x3bc   :  { %1420 = vmatpush.msra.mxu2 %v3118_v42  ;;  %1440 = vmatpush.msra.mxu3 %v3119_v43 }
 0x3bd   :  { %1381 = vmatpush.msra.mxu0 %v3120_v44  ;;  %1401 = vmatpush.msra.mxu1 %v3121_v46 }
 0x3be   :  { %1421 = vmatpush.msra.mxu2 %v3122_v47  ;;  %1441 = vmatpush.msra.mxu3 %v3123_v48 }
 0x3bf   :  { %1382 = vmatpush.msra.mxu0 %v3124_v49  ;;  %1402 = vmatpush.msra.mxu1 %v3125_v53 }
 0x3c0   :  { %1422 = vmatpush.msra.mxu2 %v3126_v61  ;;  %1442 = vmatpush.msra.mxu3 %v3127_v52 }
 0x3c1   :  { %1383 = vmatpush.msra.mxu0 %v3128_v4  ;;  %1403 = vmatpush.msra.mxu1 %v3129_v19 }
 0x3c2   :  { %1423 = vmatpush.msra.mxu2 %v3130_v63  ;;  %1443 = vmatpush.msra.mxu3 %v3131_v58  ;;  %v3140_v58 = vld [vmem:[#allocation56_spill] sm:$0xff] }
 0x3c3   :  { %1384 = vmatpush.msra.mxu0 %v3132_v56  ;;  %1404 = vmatpush.msra.mxu1 %v3133_v6  ;;  %v3141_v6 = vld [vmem:[#allocation57_spill] sm:$0xff] }
 0x3c4   :  { %1424 = vmatpush.msra.mxu2 %v3134_v55  ;;  %1444 = vmatpush.msra.mxu3 %v3135_v50 }
 0x420   :  { %v1090_v51 = vpop.f32.mrf.mxu0  ;;  %v1110_v5 = vpop.f32.mrf.mxu1 }
 0x421   :  { %v1153_v32 = vadd.f32 %v1090_v51, %v3136_v57  ;;  %v1154_v54 = vadd.f32 %v1110_v5, %v3137_v59  ;;  %v3142_v57 = vld [vmem:[#allocation59_spill] sm:$0xff] }
 0x423   :  { %v1589_v62 = vmul.f32 -1.442695, %v1153_v32  ;;  %v1590_v3 = vmul.f32 -1.442695, %v1154_v54 }
 0x425   :  { %1685 = vpow2.f32 %v1589_v62 }
 0x426   :  { %1687 = vpow2.f32 %v1590_v3 }
 0x427   :  { %v1150_v60 = vpop.f32.mrf.mxu3  ;;  %v1130_v8 = vpop.f32.mrf.mxu2 }
 0x428   :  { %v1156_v0 = vadd.f32 %v1150_v60, %v3138_v1  ;;  %v1155_v13 = vadd.f32 %v1130_v8, %v3139_v21 }
 0x42a   :  { %v1591_v2 = vmul.f32 -1.442695, %v1156_v0 }
 0x42b   :  { %v1686_v34 = vpop.eup %1685 }
 0x42c   :  { %v1688_v15 = vpop.eup %1687  ;;  %v1160_v18 = vadd.f32 1.0, %v1686_v34  ;;  %1689 = vpow2.f32 %v1591_v2 }
 0x42d   :  { %v1179_v7 = vadd.f32 1.0, %v1688_v15  ;;  %v3143_v15 = vld [vmem:[#allocation58_spill] sm:$0xff] }
 0x42e   :  { %1691 = vrcp.f32 %v1160_v18  ;;  %v1172_v11 = vand.u32 2147483648, %v1160_v18  ;;  %v1170_v16 = vand.u32 2147483647, %v1160_v18  ;;  %vm1166_vm0 = vweird.f32 %v1160_v18 }
 0x42f   :  { %1693 = vrcp.f32 %v1179_v7  ;;  %v1191_v26 = vand.u32 2147483648, %v1179_v7  ;;  %v1189_v20 = vand.u32 2147483647, %v1179_v7  ;;  %vm1185_vm1 = vweird.f32 %v1179_v7 }
 0x430   :  { %v1173_v9 = vor.u32 1.1754944e-38, %v1172_v11  ;;  %vm1171_vm4 = vcmp.eq.f32.partialorder %v1170_v16, 8.507059e+37 }
 0x431   :  { %v1192_v35 = vor.u32 1.1754944e-38, %v1191_v26  ;;  %vm1190_vm5 = vcmp.eq.f32.partialorder %v1189_v20, 8.507059e+37 }
 0x432   :  { %v1690_v12 = vpop.eup %1689 }
 0x433   :  { %v1199_v17 = vadd.f32 1.0, %v1690_v12 }
 0x434   :  { %v1692_v10 = vpop.eup %1691 }
 0x435   :  { %v1694_v30 = vpop.eup %1693  ;;  %v1162_v27 = vmul.f32 %v1692_v10, %v1160_v18  ;;  %1695 = vrcp.f32 %v1199_v17  ;;  %vm1167_vm14 = vweird.f32 %v1692_v10  ;;  %v1211_v48 = vand.u32 2147483648, %v1199_v17 }
 0x436   :  { %v1181_v22 = vmul.f32 %v1694_v30, %v1179_v7  ;;  %1697 = vtanh.f32 %v1155_v13  ;;  %vm1186_vm15 = vweird.f32 %v1694_v30  ;;  %vm1168_vm2 = vmor %vm1166_vm0, %vm1167_vm14  ;;  %vm1205_vm7 = vweird.f32 %v1199_v17 }
 0x437   :  { %v1163_v23 = vsub.f32 1.0, %v1162_v27  ;;  %vm1187_vm3 = vmor %vm1185_vm1, %vm1186_vm15  ;;  %v1209_v49 = vand.u32 2147483647, %v1199_v17  ;;  %v1212_v61 = vor.u32 1.1754944e-38, %v1211_v48 }
 0x438   :  { %v1182_v29 = vsub.f32 1.0, %v1181_v22 }
 0x439   :  { %v1164_v28 = vmul.f32 %v1692_v10, %v1163_v23  ;;  %vm1210_vm9 = vcmp.eq.f32.partialorder %v1209_v49, 8.507059e+37 }
 0x43a   :  { %v1183_v25 = vmul.f32 %v1694_v30, %v1182_v29 }
 0x43b   :  { %v1696_v24 = vpop.eup %1695  ;;  %v1165_v33 = vadd.f32 %v1692_v10, %v1164_v28 }
 0x43c   :  { %v1184_v14 = vadd.f32 %v1694_v30, %v1183_v25  ;;  %v1201_v45 = vmul.f32 %v1696_v24, %v1199_v17  ;;  %v1698_v37 = vpop.eup %1697  ;;  %vm1206_vm6 = vweird.f32 %v1696_v24 }
 0x43d   :  { %v1169_v36 = vsel %vm1168_vm2, %v1692_v10, %v1165_v33  ;;  %vm1207_vm8 = vmor %vm1205_vm7, %vm1206_vm6 }
 0x43e   :  { %v1174_v38 = vsel %vm1171_vm4, %v1173_v9, %v1169_v36  ;;  %v1188_v39 = vsel %vm1187_vm3, %v1694_v30, %v1184_v14  ;;  %v1202_v40 = vsub.f32 1.0, %v1201_v45 }
 0x43f   :  { %v1193_v41 = vsel %vm1190_vm5, %v1192_v35, %v1188_v39  ;;  %v1216_v42 = vmul.f32 %v1698_v37, %v1174_v38 }
 0x440   :  { %v1215_v43 = vmul.f32 %v1193_v41, %v2757_v31  ;;  %v1203_v44 = vmul.f32 %v1696_v24, %v1202_v40 }
 0x442   :  { %v2829_v46 = vadd.f32 %v1216_v42, %v1215_v43  ;;  %v1204_v47 = vadd.f32 %v1696_v24, %v1203_v44 }
 0x444   :  { %1699 = vtanh.f32 %v2829_v46  ;;  %v1208_v53 = vsel %vm1207_vm8, %v1696_v24, %v1204_v47 }
 0x445   :  { %v1213_v4 = vsel %vm1210_vm9, %v1212_v61, %v1208_v53  ;;  %v3144_v53 = vld [vmem:[#allocation60_spill] sm:$0xff] }
 0x44a   :  { %v1700_v52 = vpop.eup %1699 }
 0x44b   :  { %v1219_v19 = vmul.f32 %v1700_v52, %v1213_v4  ;;  %v3145_v52 = vld [vmem:[#allocation61_spill] sm:$0xff] }
 0x44d   :  { %1220 = vst [vmem:[#allocation7 + $0x28] sm:$0xff] %v1219_v19  ;;  %1237 = vmatmul.f32.vlgmr.msrb.gmra.mxu0 %v1219_v19  ;;  %1257 = vmatmul.f32.vlgmr.msrb.gmra.mxu1 %v1219_v19 }
 0x44e   :  { %1277 = vmatmul.f32.vlgmr.msrb.gmra.mxu2 %v1219_v19  ;;  %1297 = vmatmul.f32.vlgmr.msrb.gmra.mxu3 %v1219_v19 }
 0x4ca   :  { %v1238_v31 = vpop.f32.mrf.mxu0  ;;  %v1258_v63 = vpop.f32.mrf.mxu1 }
 0x4cb   :  { %v1301_v56 = vadd.f32 %v1238_v31, %v3140_v58  ;;  %v1302_v55 = vadd.f32 %v1258_v63, %v3141_v6  ;;  %v3146_v58 = vld [vmem:[#allocation63_spill] sm:$0xff] }
 0x4cd   :  { %v1592_v50 = vmul.f32 -1.442695, %v1301_v56  ;;  %v1593_v51 = vmul.f32 -1.442695, %v1302_v55 }
 0x4cf   :  { %1701 = vpow2.f32 %v1592_v50 }
 0x4d0   :  { %1703 = vpow2.f32 %v1593_v51 }
 0x4d1   :  { %v1298_v5 = vpop.f32.mrf.mxu3  ;;  %v1278_v1 = vpop.f32.mrf.mxu2 }
 0x4d2   :  { %v1304_v32 = vadd.f32 %v1298_v5, %v3142_v57  ;;  %v1303_v18 = vadd.f32 %v1278_v1, %v3143_v15 }
 0x4d4   :  { %v1594_v59 = vmul.f32 -1.442695, %v1304_v32 }
 0x4d5   :  { %v1702_v54 = vpop.eup %1701 }
 0x4d6   :  { %v1704_v62 = vpop.eup %1703  ;;  %v1308_v3 = vadd.f32 1.0, %v1702_v54  ;;  %1705 = vpow2.f32 %v1594_v59 }
 0x4d7   :  { %v1327_v60 = vadd.f32 1.0, %v1704_v62  ;;  %v3147_v62 = vld [vmem:[#allocation62_spill] sm:$0xff] }
 0x4d8   :  { %1707 = vrcp.f32 %v1308_v3  ;;  %v1320_v21 = vand.u32 2147483648, %v1308_v3  ;;  %v1318_v27 = vand.u32 2147483647, %v1308_v3  ;;  %vm1314_vm12 = vweird.f32 %v1308_v3 }
 0x4d9   :  { %1709 = vrcp.f32 %v1327_v60  ;;  %v1339_v13 = vand.u32 2147483648, %v1327_v60  ;;  %v1337_v23 = vand.u32 2147483647, %v1327_v60  ;;  %vm1333_vm13 = vweird.f32 %v1327_v60 }
 0x4da   :  { %v1321_v26 = vor.u32 1.1754944e-38, %v1320_v21  ;;  %vm1319_vm0 = vcmp.eq.f32.partialorder %v1318_v27, 8.507059e+37 }
 0x4db   :  { %v1340_v25 = vor.u32 1.1754944e-38, %v1339_v13  ;;  %vm1338_vm1 = vcmp.eq.f32.partialorder %v1337_v23, 8.507059e+37 }
 0x4dc   :  { %v1706_v0 = vpop.eup %1705 }
 0x4dd   :  { %v1347_v2 = vadd.f32 1.0, %v1706_v0 }
 0x4de   :  { %v1708_v34 = vpop.eup %1707 }
 0x4df   :  { %v1710_v7 = vpop.eup %1709  ;;  %v1310_v8 = vmul.f32 %v1708_v34, %v1308_v3  ;;  %1711 = vrcp.f32 %v1347_v2  ;;  %vm1315_vm10 = vweird.f32 %v1708_v34  ;;  %v1359_v40 = vand.u32 2147483648, %v1347_v2 }
 0x4e0   :  { %v1329_v12 = vmul.f32 %v1710_v7, %v1327_v60  ;;  %1713 = vtanh.f32 %v1303_v18  ;;  %vm1334_vm11 = vweird.f32 %v1710_v7  ;;  %vm1316_vm14 = vmor %vm1314_vm12, %vm1315_vm10  ;;  %vm1353_vm3 = vweird.f32 %v1347_v2 }
 0x4e1   :  { %v1311_v17 = vsub.f32 1.0, %v1310_v8  ;;  %vm1335_vm15 = vmor %vm1333_vm13, %vm1334_vm11  ;;  %v1357_v41 = vand.u32 2147483647, %v1347_v2  ;;  %v1360_v43 = vor.u32 1.1754944e-38, %v1359_v40 }
 0x4e2   :  { %v1330_v10 = vsub.f32 1.0, %v1329_v12 }
 0x4e3   :  { %v1312_v30 = vmul.f32 %v1708_v34, %v1311_v17  ;;  %vm1358_vm5 = vcmp.eq.f32.partialorder %v1357_v41, 8.507059e+37 }
 0x4e4   :  { %v1331_v22 = vmul.f32 %v1710_v7, %v1330_v10 }
 0x4e5   :  { %v1712_v29 = vpop.eup %1711  ;;  %v1313_v11 = vadd.f32 %v1708_v34, %v1312_v30 }
 0x4e6   :  { %v1332_v28 = vadd.f32 %v1710_v7, %v1331_v22  ;;  %v1349_v16 = vmul.f32 %v1712_v29, %v1347_v2  ;;  %v1714_v24 = vpop.eup %1713  ;;  %vm1354_vm2 = vweird.f32 %v1712_v29 }
 0x4e7   :  { %v1317_v20 = vsel %vm1316_vm14, %v1708_v34, %v1313_v11  ;;  %vm1355_vm4 = vmor %vm1353_vm3, %vm1354_vm2 }
 0x4e8   :  { %v1322_v33 = vsel %vm1319_vm0, %v1321_v26, %v1317_v20  ;;  %v1336_v9 = vsel %vm1335_vm15, %v1710_v7, %v1332_v28  ;;  %v1350_v14 = vsub.f32 1.0, %v1349_v16 }
 0x4e9   :  { %v1341_v45 = vsel %vm1338_vm1, %v1340_v25, %v1336_v9  ;;  %v1364_v35 = vmul.f32 %v1714_v24, %v1322_v33 }
 0x4ea   :  { %v1363_v36 = vmul.f32 %v1341_v45, %v2829_v46  ;;  %v1351_v37 = vmul.f32 %v1712_v29, %v1350_v14 }
 0x4ec   :  { %v2837_v38 = vadd.f32 %v1364_v35, %v1363_v36  ;;  %v1352_v39 = vadd.f32 %v1712_v29, %v1351_v37 }
 0x4ee   :  { %1715 = vtanh.f32 %v2837_v38  ;;  %v1356_v42 = vsel %vm1355_vm4, %v1712_v29, %v1352_v39 }
 0x4ef   :  { %v1361_v47 = vsel %vm1358_vm5, %v1360_v43, %v1356_v42 }
 0x4f4   :  { %v1716_v44 = vpop.eup %1715 }
 0x4f5   :  { %v1367_v48 = vmul.f32 %v1716_v44, %v1361_v47 }
 0x4f7   :  { %1368 = vst [vmem:[#allocation7 + $0x30] sm:$0xff] %v1367_v48  ;;  %1385 = vmatmul.f32.vlgmr.msra.gmra.mxu0 %v1367_v48  ;;  %1405 = vmatmul.f32.vlgmr.msra.gmra.mxu1 %v1367_v48 }
 0x4f8   :  { %1425 = vmatmul.f32.vlgmr.msra.gmra.mxu2 %v1367_v48  ;;  %1445 = vmatmul.f32.vlgmr.msra.gmra.mxu3 %v1367_v48 }
 0x574   :  { %v1386_v46 = vpop.f32.mrf.mxu0  ;;  %v1406_v49 = vpop.f32.mrf.mxu1 }
 0x575   :  { %v1449_v61 = vadd.f32 %v1386_v46, %v3144_v53  ;;  %v1450_v4 = vadd.f32 %v1406_v49, %v3145_v52 }
 0x577   :  { %v1595_v19 = vmul.f32 -1.442695, %v1449_v61  ;;  %v1596_v31 = vmul.f32 -1.442695, %v1450_v4 }
 0x579   :  { %1717 = vpow2.f32 %v1595_v19 }
 0x57a   :  { %1719 = vpow2.f32 %v1596_v31 }
 0x57b   :  { %v1446_v63 = vpop.f32.mrf.mxu3  ;;  %v1426_v57 = vpop.f32.mrf.mxu2 }
 0x57c   :  { %v1452_v56 = vadd.f32 %v1446_v63, %v3146_v58  ;;  %v1451_v3 = vadd.f32 %v1426_v57, %v3147_v62 }
 0x57e   :  { %v1597_v6 = vmul.f32 -1.442695, %v1452_v56 }
 0x57f   :  { %v1718_v55 = vpop.eup %1717 }
 0x580   :  { %v1720_v50 = vpop.eup %1719  ;;  %v1456_v51 = vadd.f32 1.0, %v1718_v55  ;;  %1721 = vpow2.f32 %v1597_v6 }
 0x581   :  { %v1475_v5 = vadd.f32 1.0, %v1720_v50 }
 0x582   :  { %1723 = vrcp.f32 %v1456_v51  ;;  %v1468_v15 = vand.u32 2147483648, %v1456_v51  ;;  %v1466_v8 = vand.u32 2147483647, %v1456_v51  ;;  %vm1462_vm8 = vweird.f32 %v1456_v51 }
 0x583   :  { %1725 = vrcp.f32 %v1475_v5  ;;  %v1487_v18 = vand.u32 2147483648, %v1475_v5  ;;  %v1485_v17 = vand.u32 2147483647, %v1475_v5  ;;  %vm1481_vm9 = vweird.f32 %v1475_v5 }
 0x584   :  { %v1469_v13 = vor.u32 1.1754944e-38, %v1468_v15  ;;  %vm1467_vm12 = vcmp.eq.f32.partialorder %v1466_v8, 8.507059e+37 }
 0x585   :  { %v1488_v22 = vor.u32 1.1754944e-38, %v1487_v18  ;;  %vm1486_vm13 = vcmp.eq.f32.partialorder %v1485_v17, 8.507059e+37 }
 0x586   :  { %v1722_v32 = vpop.eup %1721 }
 0x587   :  { %v1495_v59 = vadd.f32 1.0, %v1722_v32 }
 0x588   :  { %v1724_v54 = vpop.eup %1723 }
 0x589   :  { %v1726_v60 = vpop.eup %1725  ;;  %v1458_v1 = vmul.f32 %v1724_v54, %v1456_v51  ;;  %1727 = vrcp.f32 %v1495_v59  ;;  %vm1463_vm6 = vweird.f32 %v1724_v54  ;;  %v1507_v14 = vand.u32 2147483648, %v1495_v59 }
 0x58a   :  { %v1477_v0 = vmul.f32 %v1726_v60, %v1475_v5  ;;  %1729 = vtanh.f32 %v1451_v3  ;;  %vm1482_vm7 = vweird.f32 %v1726_v60  ;;  %vm1464_vm10 = vmor %vm1462_vm8, %vm1463_vm6  ;;  %vm1501_vm15 = vweird.f32 %v1495_v59 }
 0x58b   :  { %v1459_v2 = vsub.f32 1.0, %v1458_v1  ;;  %vm1483_vm11 = vmor %vm1481_vm9, %vm1482_vm7  ;;  %v1505_v45 = vand.u32 2147483647, %v1495_v59  ;;  %v1508_v36 = vor.u32 1.1754944e-38, %v1507_v14 }
 0x58c   :  { %v1478_v34 = vsub.f32 1.0, %v1477_v0 }
 0x58d   :  { %v1460_v7 = vmul.f32 %v1724_v54, %v1459_v2  ;;  %vm1506_vm1 = vcmp.eq.f32.partialorder %v1505_v45, 8.507059e+37 }
 0x58e   :  { %v1479_v12 = vmul.f32 %v1726_v60, %v1478_v34 }
 0x58f   :  { %v1728_v10 = vpop.eup %1727  ;;  %v1461_v21 = vadd.f32 %v1724_v54, %v1460_v7 }
 0x590   :  { %v1480_v30 = vadd.f32 %v1726_v60, %v1479_v12  ;;  %v1497_v27 = vmul.f32 %v1728_v10, %v1495_v59  ;;  %v1730_v29 = vpop.eup %1729  ;;  %vm1502_vm14 = vweird.f32 %v1728_v10 }
 0x591   :  { %v1465_v23 = vsel %vm1464_vm10, %v1724_v54, %v1461_v21  ;;  %vm1503_vm0 = vmor %vm1501_vm15, %vm1502_vm14 }
 0x592   :  { %v1470_v11 = vsel %vm1467_vm12, %v1469_v13, %v1465_v23  ;;  %v1484_v26 = vsel %vm1483_vm11, %v1726_v60, %v1480_v30  ;;  %v1498_v28 = vsub.f32 1.0, %v1497_v27 }
 0x593   :  { %v1489_v16 = vsel %vm1486_vm13, %v1488_v22, %v1484_v26  ;;  %v1512_v25 = vmul.f32 %v1730_v29, %v1470_v11 }
 0x594   :  { %v1511_v20 = vmul.f32 %v1489_v16, %v2837_v38  ;;  %v1499_v24 = vmul.f32 %v1728_v10, %v1498_v28 }
 0x596   :  { %v1513_v33 = vadd.f32 %v1512_v25, %v1511_v20  ;;  %v1500_v9 = vadd.f32 %v1728_v10, %v1499_v24 }
 0x598   :  { %1731 = vtanh.f32 %v1513_v33  ;;  %v1504_v35 = vsel %vm1503_vm0, %v1728_v10, %v1500_v9 }
 0x599   :  { %v1509_v38 = vsel %vm1506_vm1, %v1508_v36, %v1504_v35 }
 0x59e   :  { %v1732_v37 = vpop.eup %1731 }
 0x59f   :  { %v1515_v39 = vmul.f32 %v1732_v37, %v1509_v38 }
 0x5a1   :  { %1516 = vst [vmem:[#allocation7 + $0x38] sm:$0xff] %v1515_v39 }
 0x5a2   :  { %1531 = dma.vmem_to_hbm [thread:$0]  %s1524_s15, 1024, %s1526_s18, [#allocation6], %s1854_s19, %s1854_s19, %s1855_s20  }
 0x5a3   :  { %1847 = dma.done.wait [#allocation6], 1024  }
 0x5a4   :  { %1848 = vsyncadd [#allocation6], 4294966272 }
 0x5a5   :  { %1536 = vsyncpa [#allocation5], 1 }
 0x5a6   :  { %1537 = vsyncpa [#allocation6], 1 }

</bundles_post_ra>
